<compile_context>
chip_gen: v7x
topology: tpu7x:2x2x1
jax: 0.10.0
libtpu: 0.0.40
codegen_flags: <defaults>
</compile_context>

<pallas_src>
import jax
import jax.numpy as jnp
import numpy as np
from jax import lax
from jax.experimental import pallas as pl
from jax.experimental.pallas import tpu as pltpu  # noqa: F401  (TPU backend)

# ----------------------------- sizes -----------------------------
B = 2            # batch (per sentence)
S = 8            # sequence length
V = 50           # vocab size
VP = 64          # vocab padded (contraction dim of the in-kernel one-hot gather)
E = 32           # emsize
H = 32           # nhid
D = 2 * H        # nhid * num_directions = 64
FC = 64          # fc_dim
C = 3            # num_class for the selected task
TB = 2 * B       # both sentences stacked on the batch axis = 4 real rows
TBP = 8          # batch rows padded to a full sublane tile
F4 = 4 * H       # packed recurrence width [priv_f | priv_b | shr_f | shr_b] = 128
F_IN = 8 * D     # FFN input dim = nhid * num_directions * 8 = 512
STBP = S * TBP   # 64 time-major rows


# =================================================================
# Fused kernel: embedding + encoders + pooling + diff loss + FFN
# =================================================================
def fused_generator_kernel(tok_ref, emb_ref, wenc_ref, bias_ref,
                           w1_ref, w23_ref, out_ref):
    f32 = jnp.float32

    # ---- unpack consolidated weight slabs (static slices, trace-time) ----
    wenc = wenc_ref[...]                       # (E + 4H, 4H)
    wih = wenc[0:E, :]                         # (E, 4H)   cols [pf | pb | sf | sb]
    whh = wenc[E:E + F4, :]                    # (4H, 4H)  block-diagonal
    bias = bias_ref[...]                       # (3, 128)
    b_enc = bias[0:1, :]                       # (1, 4H)
    b1 = bias[1:2, 0:FC]
    b2 = bias[1:2, FC:2 * FC]
    b3 = bias[2:3, 0:C]
    w23 = w23_ref[...]                         # (FC, 128)
    w2 = w23[:, 0:FC]
    w3 = w23[:, FC:FC + C]

    # ---- 1. fused embedding lookup: one-hot @ table (one MXU pass) ----
    tok = tok_ref[...]                                             # (STBP, 1) int32
    vocab = lax.broadcasted_iota(jnp.int32, (STBP, VP), 1)
    onehot = (tok == vocab).astype(f32)                            # (STBP, VP)
    x = jnp.dot(onehot, emb_ref[...], preferred_element_type=f32)  # (STBP, E)

    # ---- 2. input projection hoisted out of the recurrence ----
    xproj = jnp.dot(x, wih, preferred_element_type=f32) + b_enc    # (STBP, 4H)

    # forward/backward time realignment, done ONCE outside the serial chain:
    # column block b (width H) is a forward direction iff (col & H) == 0
    col = lax.broadcasted_iota(jnp.int32, (1, F4), 1)
    fwd_mask = jnp.bitwise_and(col, H) == 0                        # (1, 4H) bool

    xg = [xproj[t * TBP:(t + 1) * TBP, :] for t in range(S)]       # S x (TBP, 4H)
    xs = [jnp.where(fwd_mask, xg[t], xg[S - 1 - t]) for t in range(S)]

    # ---- 3. fused bidirectional recurrence (private + shared encoders) ----
    h = jnp.zeros((TBP, F4), f32)
    hs = []
    for t in range(S):                       # S static & tiny -> fully unrolled
        h = jnp.tanh(xs[t] + jnp.dot(h, whh, preferred_element_type=f32))
        hs.append(h)

    # ---- 4. max pooling over time: tree of jnp.maximum over row groups ----
    groups = list(hs)
    while len(groups) > 1:
        groups = [jnp.maximum(groups[i], groups[i + 1])
                  for i in range(0, len(groups), 2)]
    pooled = groups[0]                       # (TBP, 4H) = [priv_rep | shr_rep]

    # ---- 5. adversarial diff loss: one 2-D MXU pass + static same-batch mask ----
    # time-aligned hidden slab (backward columns of step t hold time S-1-t)
    hslab = jnp.concatenate(hs, axis=0)          # (STBP, 4H), step-major rows
    hrev = jnp.concatenate(hs[::-1], axis=0)
    haln = jnp.where(fwd_mask, hslab, hrev)      # every row group = one time step

    priv = haln[:, 0:D]                          # (STBP, D)
    shr = haln[:, D:F4]                          # (STBP, D)
    a = lax.dot_general(priv, shr, (((1,), (1,)), ((), ())),
                        preferred_element_type=f32)            # (STBP, STBP)
    ri = lax.broadcasted_iota(jnp.int32, (STBP, STBP), 0)
    ci = lax.broadcasted_iota(jnp.int32, (STBP, STBP), 1)
    rb = jnp.bitwise_and(ri, TBP - 1)            # row batch index (row % TBP)
    cb = jnp.bitwise_and(ci, TBP - 1)
    mask = jnp.logical_and(rb == cb, rb < TB)    # same batch & not padding
    diff = jnp.sum(jnp.where(mask, a * a, 0.0)) / B

    # ---- 6. feature combination + nonlinear FFN head (dropout = identity) ----
    c1 = pooled[0:B, :]                          # (B, 2D) = [priv_rep1 | shr_rep1]
    c2 = pooled[B:2 * B, :]                      # (B, 2D) = [priv_rep2 | shr_rep2]
    feat = jnp.concatenate([c1, c2, c1 * c2, jnp.abs(c1 - c2)], axis=1)  # (B, 8D)

    h1 = jnp.tanh(jnp.dot(feat, w1_ref[...], preferred_element_type=f32) + b1)
    h2 = jnp.tanh(jnp.dot(h1, w2, preferred_element_type=f32) + b2)
    scores = jnp.dot(h2, w3, preferred_element_type=f32) + b3            # (B, C)

    # ---- 7. single lane-dense (TBP, 4H) output slab, one unmasked store ----
    shr_rep = pooled[:, D:F4]                                            # (TBP, D)
    scores_pad = jnp.concatenate([scores, jnp.zeros((B, D - C), f32)], axis=1)
    diff_row = jnp.concatenate([diff.reshape(1, 1),
                                jnp.zeros((1, D - 1), f32)], axis=1)
    fill = jnp.zeros((TBP - B - 1, D), f32)
    right = jnp.concatenate([scores_pad, diff_row, fill], axis=0)        # (TBP, D)
    out_ref[...] = jnp.concatenate([shr_rep, right], axis=1)             # (TBP, 4H)


# =================================================================
# Wrapper: pack weights / tokens, single pallas_call, slice outputs
# =================================================================
def _pack_weights(params):
    ep, es, ffn = params["enc_private"], params["enc_shared"], params["ffn"]
    # feature column order: [priv_fwd | priv_bwd | shr_fwd | shr_bwd]
    wih = jnp.concatenate([ep["wih_f"], ep["wih_b"], es["wih_f"], es["wih_b"]],
                          axis=1)                                   # (E, 4H)
    whh = jnp.zeros((F4, F4), jnp.float32)                          # block-diag
    whh = whh.at[0:H, 0:H].set(ep["whh_f"])
    whh = whh.at[H:2 * H, H:2 * H].set(ep["whh_b"])
    whh = whh.at[2 * H:3 * H, 2 * H:3 * H].set(es["whh_f"])
    whh = whh.at[3 * H:4 * H, 3 * H:4 * H].set(es["whh_b"])
    wenc = jnp.concatenate([wih, whh], axis=0)                      # (E+4H, 4H)

    b_enc = jnp.concatenate([ep["b_f"], ep["b_b"], es["b_f"], es["b_b"]],
                            axis=1)                                 # (1, 4H)
    b12 = jnp.concatenate([ffn["b1"], ffn["b2"]], axis=1)           # (1, 128)
    b3 = jnp.concatenate([ffn["b3"], jnp.zeros((1, F4 - C), jnp.float32)], axis=1)
    bias = jnp.concatenate([b_enc, b12, b3], axis=0)                # (3, 128)

    w23 = jnp.concatenate([ffn["w2"], ffn["w3"],
                           jnp.zeros((FC, F4 - FC - C), jnp.float32)], axis=1)  # (FC,128)

    emb_pad = jnp.concatenate([params["emb_table"],
                               jnp.zeros((VP - V, E), jnp.float32)], axis=0)    # (VP, E)
    return emb_pad, wenc, bias, ffn["w1"], w23


def generator_forward(params, sent1, sent_len1, sent2, sent_len2):
    del sent_len1, sent_len2  # TODO(synk): pack_padded_sequence semantics not modeled
    # stack both sentences on the batch axis, zero-pad to a full sublane tile
    tokens = jnp.concatenate([sent1, sent2], axis=0)                    # (TB, S)
    tokens = jnp.concatenate(
        [tokens, jnp.zeros((TBP - TB, S), jnp.int32)], axis=0)          # (TBP, S)
    tok_tm = jnp.transpose(tokens, (1, 0)).reshape(STBP, 1)             # time-major

    emb_pad, wenc, bias, w1, w23 = _pack_weights(params)

    out = pl.pallas_call(
        fused_generator_kernel,
        out_shape=jax.ShapeDtypeStruct((TBP, F4), jnp.float32),  # single lane-dense slab
    )(tok_tm, emb_pad, wenc, bias, w1, w23)

    sr1 = out[0:B, 0:D]                 # shared_sent_rep1
    sr2 = out[B:TB, 0:D]                # shared_sent_rep2
    scores = out[0:B, D:D + C]          # task scores
    diff = out[B, D]                    # diff_loss (scalar)
    return scores, diff, (sr1, sr2)


# =================================================================
# Parameter construction (deterministic, synthetic)
# =================================================================
def init_encoder(key):
    ks = jax.random.split(key, 4)
    sc_e = 1.0 / np.sqrt(E)
    sc_h = 1.0 / np.sqrt(H)
    return {
        "wih_f": jax.random.normal(ks[0], (E, H), jnp.float32) * sc_e,
        "whh_f": jax.random.normal(ks[1], (H, H), jnp.float32) * sc_h,
        "b_f": jnp.zeros((1, H), jnp.float32),
        "wih_b": jax.random.normal(ks[2], (E, H), jnp.float32) * sc_e,
        "whh_b": jax.random.normal(ks[3], (H, H), jnp.float32) * sc_h,
        "b_b": jnp.zeros((1, H), jnp.float32),
    }


def init_params(key):
    ks = jax.random.split(key, 6)
    return {
        "emb_table": jax.random.normal(ks[0], (V, E), jnp.float32) * 0.1,
        "enc_private": init_encoder(ks[1]),   # self.encoder[task_idx['taskA']]
        "enc_shared": init_encoder(ks[2]),    # self.generator
        "ffn": {
            "w1": jax.random.normal(ks[3], (F_IN, FC), jnp.float32) / np.sqrt(F_IN),
            "b1": jnp.zeros((1, FC), jnp.float32),
            "w2": jax.random.normal(ks[4], (FC, FC), jnp.float32) / np.sqrt(FC),
            "b2": jnp.zeros((1, FC), jnp.float32),
            "w3": jax.random.normal(ks[5], (FC, C), jnp.float32) / np.sqrt(FC),
            "b3": jnp.zeros((1, C), jnp.float32),
        },
    }


# =================================================================
# Pure-JAX reference for validation
# =================================================================
def encoder_ref(emb, p):
    hp = lax.Precision.HIGHEST
    xs = jnp.transpose(emb, (1, 0, 2))   # (S, B, E)

    def step(w_ih, w_hh, b):
        def f(h, x):
            h = jnp.tanh(jnp.dot(x, w_ih, precision=hp)
                         + jnp.dot(h, w_hh, precision=hp) + b[0])
            return h, h
        return f

    h0 = jnp.zeros((emb.shape[0], H), jnp.float32)
    _, of = lax.scan(step(p["wih_f"], p["whh_f"], p["b_f"]), h0, xs)
    _, ob = lax.scan(step(p["wih_b"], p["whh_b"], p["b_b"]), h0, xs[::-1])
    hidden = jnp.concatenate([of, ob[::-1]], axis=-1)
    return jnp.transpose(hidden, (1, 0, 2))


def generator_ref(params, sent1, sent2):
    hp = lax.Precision.HIGHEST
    emb1 = jnp.take(params["emb_table"], sent1, axis=0)
    emb2 = jnp.take(params["emb_table"], sent2, axis=0)
    p1 = encoder_ref(emb1, params["enc_private"])
    p2 = encoder_ref(emb2, params["enc_private"])
    s1 = encoder_ref(emb1, params["enc_shared"])
    s2 = encoder_ref(emb2, params["enc_shared"])

    priv1, shr1 = jnp.max(p1, 1), jnp.max(s1, 1)
    priv2, shr2 = jnp.max(p2, 1), jnp.max(s2, 1)
    a1 = jnp.einsum('bsh,bth->bst', p1, s1, precision=hp)
    a2 = jnp.einsum('bsh,bth->bst', p2, s2, precision=hp)
    diff = jnp.sum(a1 * a1) / B + jnp.sum(a2 * a2) / B
    c1 = jnp.concatenate([priv1, shr1], 1)
    c2 = jnp.concatenate([priv2, shr2], 1)
    feat = jnp.concatenate([c1, c2, c1 * c2, jnp.abs(c1 - c2)], 1)
    ffn = params["ffn"]
    h1 = jnp.tanh(jnp.dot(feat, ffn["w1"], precision=hp) + ffn["b1"])
    h2 = jnp.tanh(jnp.dot(h1, ffn["w2"], precision=hp) + ffn["b2"])
    scores = jnp.dot(h2, ffn["w3"], precision=hp) + ffn["b3"]
    return scores, diff, (shr1, shr2)


# =================================================================
if __name__ == "__main__":
    key = jax.random.PRNGKey(0)
    kp, k1, k2 = jax.random.split(key, 3)
    params = init_params(kp)

    batch_sentence1 = jax.random.randint(k1, (B, S), 0, V, dtype=jnp.int32)
    batch_sentence2 = jax.random.randint(k2, (B, S), 0, V, dtype=jnp.int32)
    sent_len1 = jnp.full((B,), S, dtype=jnp.int32)
    sent_len2 = jnp.full((B,), S, dtype=jnp.int32)

    fwd = jax.jit(generator_forward)
    scores, diff_loss, (sr1, sr2) = fwd(params, batch_sentence1, sent_len1,
                                        batch_sentence2, sent_len2)
    jax.block_until_ready((scores, diff_loss, sr1, sr2))

    # validate against pure-JAX reference
    r_scores, r_diff, (r_sr1, r_sr2) = jax.jit(generator_ref)(
        params, batch_sentence1, batch_sentence2)
    np.testing.assert_allclose(np.asarray(scores), np.asarray(r_scores),
                               rtol=1e-2, atol=1e-2)
    np.testing.assert_allclose(np.asarray(diff_loss), np.asarray(r_diff),
                               rtol=1e-2, atol=1e-2)
    np.testing.assert_allclose(np.asarray(sr1), np.asarray(r_sr1),
                               rtol=1e-2, atol=1e-2)
    np.testing.assert_allclose(np.asarray(sr2), np.asarray(r_sr2),
                               rtol=1e-2, atol=1e-2)

    print("KERNEL_OK")
</pallas_src>

<mosaic_0001>
module attributes {stable_mosaic.version = 11 : i64} {
  func.func @fused_generator_kernel(%arg0: memref<64x1xi32, #tpu.memory_space<vmem>>, %arg1: memref<64x32xf32, #tpu.memory_space<vmem>>, %arg2: memref<160x128xf32, #tpu.memory_space<vmem>>, %arg3: memref<3x128xf32, #tpu.memory_space<vmem>>, %arg4: memref<512x64xf32, #tpu.memory_space<vmem>>, %arg5: memref<64x128xf32, #tpu.memory_space<vmem>>, %arg6: memref<8x128xf32, #tpu.memory_space<vmem>>) attributes {dimension_semantics = [], scalar_prefetch = 0 : i64, scratch_operands = 0 : i64, tpu.core_type = #tpu.core_type<tc>} {
    %c0 = arith.constant 0 : index
    %c0_0 = arith.constant 0 : index
    %0 = vector.load %arg2[%c0, %c0_0] : memref<160x128xf32, #tpu.memory_space<vmem>>, vector<160x128xf32>
    %1 = vector.extract_strided_slice %0 {offsets = [0, 0], sizes = [32, 128], strides = [1, 1]} : vector<160x128xf32> to vector<32x128xf32>
    %2 = vector.extract_strided_slice %0 {offsets = [32, 0], sizes = [128, 128], strides = [1, 1]} : vector<160x128xf32> to vector<128x128xf32>
    %c0_1 = arith.constant 0 : index
    %c0_2 = arith.constant 0 : index
    %3 = vector.load %arg3[%c0_1, %c0_2] : memref<3x128xf32, #tpu.memory_space<vmem>>, vector<3x128xf32>
    %4 = vector.extract_strided_slice %3 {offsets = [0, 0], sizes = [1, 128], strides = [1, 1]} : vector<3x128xf32> to vector<1x128xf32>
    %5 = vector.extract_strided_slice %3 {offsets = [1, 0], sizes = [1, 64], strides = [1, 1]} : vector<3x128xf32> to vector<1x64xf32>
    %6 = vector.extract_strided_slice %3 {offsets = [1, 64], sizes = [1, 64], strides = [1, 1]} : vector<3x128xf32> to vector<1x64xf32>
    %7 = vector.extract_strided_slice %3 {offsets = [2, 0], sizes = [1, 3], strides = [1, 1]} : vector<3x128xf32> to vector<1x3xf32>
    %c0_3 = arith.constant 0 : index
    %c0_4 = arith.constant 0 : index
    %8 = vector.load %arg5[%c0_3, %c0_4] : memref<64x128xf32, #tpu.memory_space<vmem>>, vector<64x128xf32>
    %9 = vector.extract_strided_slice %8 {offsets = [0, 0], sizes = [64, 64], strides = [1, 1]} : vector<64x128xf32> to vector<64x64xf32>
    %10 = vector.extract_strided_slice %8 {offsets = [0, 64], sizes = [64, 3], strides = [1, 1]} : vector<64x128xf32> to vector<64x3xf32>
    %c0_5 = arith.constant 0 : index
    %c0_6 = arith.constant 0 : index
    %11 = vector.load %arg0[%c0_5, %c0_6] : memref<64x1xi32, #tpu.memory_space<vmem>>, vector<64x1xi32>
    %12 = tpu.iota {dimensions = array<i32: 1>} : vector<64x64xi32>
    %13 = vector.broadcast %11 : vector<64x1xi32> to vector<64x64xi32>
    %14 = arith.cmpi eq, %13, %12 : vector<64x64xi32>
    %15 = arith.extui %14 : vector<64x64xi1> to vector<64x64xi32>
    %16 = arith.sitofp %15 : vector<64x64xi32> to vector<64x64xf32>
    %c0_7 = arith.constant 0 : index
    %c0_8 = arith.constant 0 : index
    %17 = vector.load %arg1[%c0_7, %c0_8] : memref<64x32xf32, #tpu.memory_space<vmem>>, vector<64x32xf32>
    %cst = arith.constant dense<0.000000e+00> : vector<64x32xf32>
    %18 = tpu.matmul %16, %17, %cst {dimension_numbers = #tpu.dot_dimension_numbers<[1], [0], [0], [1], [0, 0, 1, 1], [], []>} : vector<64x64xf32>, vector<64x32xf32>, vector<64x32xf32> -> vector<64x32xf32>
    %cst_9 = arith.constant dense<0.000000e+00> : vector<64x128xf32>
    %19 = tpu.matmul %18, %1, %cst_9 {dimension_numbers = #tpu.dot_dimension_numbers<[1], [0], [0], [1], [0, 0, 1, 1], [], []>} : vector<64x32xf32>, vector<32x128xf32>, vector<64x128xf32> -> vector<64x128xf32>
    %20 = vector.broadcast %4 : vector<1x128xf32> to vector<64x128xf32>
    %21 = arith.addf %19, %20 : vector<64x128xf32>
    %22 = tpu.iota {dimensions = array<i32: 1>} : vector<1x128xi32>
    %c32_i32 = arith.constant 32 : i32
    %23 = vector.broadcast %c32_i32 : i32 to vector<1x128xi32>
    %24 = arith.andi %22, %23 : vector<1x128xi32>
    %c0_i32 = arith.constant 0 : i32
    %25 = vector.broadcast %c0_i32 : i32 to vector<1x128xi32>
    %26 = arith.cmpi eq, %24, %25 : vector<1x128xi32>
    %27 = vector.extract_strided_slice %21 {offsets = [0, 0], sizes = [8, 128], strides = [1, 1]} : vector<64x128xf32> to vector<8x128xf32>
    %28 = vector.extract_strided_slice %21 {offsets = [8, 0], sizes = [8, 128], strides = [1, 1]} : vector<64x128xf32> to vector<8x128xf32>
    %29 = vector.extract_strided_slice %21 {offsets = [16, 0], sizes = [8, 128], strides = [1, 1]} : vector<64x128xf32> to vector<8x128xf32>
    %30 = vector.extract_strided_slice %21 {offsets = [24, 0], sizes = [8, 128], strides = [1, 1]} : vector<64x128xf32> to vector<8x128xf32>
    %31 = vector.extract_strided_slice %21 {offsets = [32, 0], sizes = [8, 128], strides = [1, 1]} : vector<64x128xf32> to vector<8x128xf32>
    %32 = vector.extract_strided_slice %21 {offsets = [40, 0], sizes = [8, 128], strides = [1, 1]} : vector<64x128xf32> to vector<8x128xf32>
    %33 = vector.extract_strided_slice %21 {offsets = [48, 0], sizes = [8, 128], strides = [1, 1]} : vector<64x128xf32> to vector<8x128xf32>
    %34 = vector.extract_strided_slice %21 {offsets = [56, 0], sizes = [8, 128], strides = [1, 1]} : vector<64x128xf32> to vector<8x128xf32>
    %35 = vector.shape_cast %26 : vector<1x128xi1> to vector<1x128xi1>
    %36 = vector.broadcast %35 : vector<1x128xi1> to vector<8x128xi1>
    %37 = arith.select %36, %27, %34 : vector<8x128xi1>, vector<8x128xf32>
    %38 = vector.shape_cast %26 : vector<1x128xi1> to vector<1x128xi1>
    %39 = vector.broadcast %38 : vector<1x128xi1> to vector<8x128xi1>
    %40 = arith.select %39, %28, %33 : vector<8x128xi1>, vector<8x128xf32>
    %41 = vector.shape_cast %26 : vector<1x128xi1> to vector<1x128xi1>
    %42 = vector.broadcast %41 : vector<1x128xi1> to vector<8x128xi1>
    %43 = arith.select %42, %29, %32 : vector<8x128xi1>, vector<8x128xf32>
    %44 = vector.shape_cast %26 : vector<1x128xi1> to vector<1x128xi1>
    %45 = vector.broadcast %44 : vector<1x128xi1> to vector<8x128xi1>
    %46 = arith.select %45, %30, %31 : vector<8x128xi1>, vector<8x128xf32>
    %47 = vector.shape_cast %26 : vector<1x128xi1> to vector<1x128xi1>
    %48 = vector.broadcast %47 : vector<1x128xi1> to vector<8x128xi1>
    %49 = arith.select %48, %31, %30 : vector<8x128xi1>, vector<8x128xf32>
    %50 = vector.shape_cast %26 : vector<1x128xi1> to vector<1x128xi1>
    %51 = vector.broadcast %50 : vector<1x128xi1> to vector<8x128xi1>
    %52 = arith.select %51, %32, %29 : vector<8x128xi1>, vector<8x128xf32>
    %53 = vector.shape_cast %26 : vector<1x128xi1> to vector<1x128xi1>
    %54 = vector.broadcast %53 : vector<1x128xi1> to vector<8x128xi1>
    %55 = arith.select %54, %33, %28 : vector<8x128xi1>, vector<8x128xf32>
    %56 = vector.shape_cast %26 : vector<1x128xi1> to vector<1x128xi1>
    %57 = vector.broadcast %56 : vector<1x128xi1> to vector<8x128xi1>
    %58 = arith.select %57, %34, %27 : vector<8x128xi1>, vector<8x128xf32>
    %cst_10 = arith.constant 0.000000e+00 : f32
    %59 = vector.broadcast %cst_10 : f32 to vector<8x128xf32>
    %cst_11 = arith.constant dense<0.000000e+00> : vector<8x128xf32>
    %60 = tpu.matmul %59, %2, %cst_11 {dimension_numbers = #tpu.dot_dimension_numbers<[1], [0], [0], [1], [0, 0, 1, 1], [], []>} : vector<8x128xf32>, vector<128x128xf32>, vector<8x128xf32> -> vector<8x128xf32>
    %61 = arith.addf %37, %60 : vector<8x128xf32>
    %62 = math.tanh %61 : vector<8x128xf32>
    %cst_12 = arith.constant dense<0.000000e+00> : vector<8x128xf32>
    %63 = tpu.matmul %62, %2, %cst_12 {dimension_numbers = #tpu.dot_dimension_numbers<[1], [0], [0], [1], [0, 0, 1, 1], [], []>} : vector<8x128xf32>, vector<128x128xf32>, vector<8x128xf32> -> vector<8x128xf32>
    %64 = arith.addf %40, %63 : vector<8x128xf32>
    %65 = math.tanh %64 : vector<8x128xf32>
    %cst_13 = arith.constant dense<0.000000e+00> : vector<8x128xf32>
    %66 = tpu.matmul %65, %2, %cst_13 {dimension_numbers = #tpu.dot_dimension_numbers<[1], [0], [0], [1], [0, 0, 1, 1], [], []>} : vector<8x128xf32>, vector<128x128xf32>, vector<8x128xf32> -> vector<8x128xf32>
    %67 = arith.addf %43, %66 : vector<8x128xf32>
    %68 = math.tanh %67 : vector<8x128xf32>
    %cst_14 = arith.constant dense<0.000000e+00> : vector<8x128xf32>
    %69 = tpu.matmul %68, %2, %cst_14 {dimension_numbers = #tpu.dot_dimension_numbers<[1], [0], [0], [1], [0, 0, 1, 1], [], []>} : vector<8x128xf32>, vector<128x128xf32>, vector<8x128xf32> -> vector<8x128xf32>
    %70 = arith.addf %46, %69 : vector<8x128xf32>
    %71 = math.tanh %70 : vector<8x128xf32>
    %cst_15 = arith.constant dense<0.000000e+00> : vector<8x128xf32>
    %72 = tpu.matmul %71, %2, %cst_15 {dimension_numbers = #tpu.dot_dimension_numbers<[1], [0], [0], [1], [0, 0, 1, 1], [], []>} : vector<8x128xf32>, vector<128x128xf32>, vector<8x128xf32> -> vector<8x128xf32>
    %73 = arith.addf %49, %72 : vector<8x128xf32>
    %74 = math.tanh %73 : vector<8x128xf32>
    %cst_16 = arith.constant dense<0.000000e+00> : vector<8x128xf32>
    %75 = tpu.matmul %74, %2, %cst_16 {dimension_numbers = #tpu.dot_dimension_numbers<[1], [0], [0], [1], [0, 0, 1, 1], [], []>} : vector<8x128xf32>, vector<128x128xf32>, vector<8x128xf32> -> vector<8x128xf32>
    %76 = arith.addf %52, %75 : vector<8x128xf32>
    %77 = math.tanh %76 : vector<8x128xf32>
    %cst_17 = arith.constant dense<0.000000e+00> : vector<8x128xf32>
    %78 = tpu.matmul %77, %2, %cst_17 {dimension_numbers = #tpu.dot_dimension_numbers<[1], [0], [0], [1], [0, 0, 1, 1], [], []>} : vector<8x128xf32>, vector<128x128xf32>, vector<8x128xf32> -> vector<8x128xf32>
    %79 = arith.addf %55, %78 : vector<8x128xf32>
    %80 = math.tanh %79 : vector<8x128xf32>
    %cst_18 = arith.constant dense<0.000000e+00> : vector<8x128xf32>
    %81 = tpu.matmul %80, %2, %cst_18 {dimension_numbers = #tpu.dot_dimension_numbers<[1], [0], [0], [1], [0, 0, 1, 1], [], []>} : vector<8x128xf32>, vector<128x128xf32>, vector<8x128xf32> -> vector<8x128xf32>
    %82 = arith.addf %58, %81 : vector<8x128xf32>
    %83 = math.tanh %82 : vector<8x128xf32>
    %84 = arith.maximumf %62, %65 : vector<8x128xf32>
    %85 = arith.maximumf %68, %71 : vector<8x128xf32>
    %86 = arith.maximumf %74, %77 : vector<8x128xf32>
    %87 = arith.maximumf %80, %83 : vector<8x128xf32>
    %88 = arith.maximumf %84, %85 : vector<8x128xf32>
    %89 = arith.maximumf %86, %87 : vector<8x128xf32>
    %90 = arith.maximumf %88, %89 : vector<8x128xf32>
    %91 = tpu.concatenate %62, %65, %68, %71, %74, %77, %80, %83 in 0 : vector<8x128xf32>, vector<8x128xf32>, vector<8x128xf32>, vector<8x128xf32>, vector<8x128xf32>, vector<8x128xf32>, vector<8x128xf32>, vector<8x128xf32> -> vector<64x128xf32>
    %92 = tpu.concatenate %83, %80, %77, %74, %71, %68, %65, %62 in 0 : vector<8x128xf32>, vector<8x128xf32>, vector<8x128xf32>, vector<8x128xf32>, vector<8x128xf32>, vector<8x128xf32>, vector<8x128xf32>, vector<8x128xf32> -> vector<64x128xf32>
    %93 = vector.shape_cast %26 : vector<1x128xi1> to vector<1x128xi1>
    %94 = vector.broadcast %93 : vector<1x128xi1> to vector<64x128xi1>
    %95 = arith.select %94, %91, %92 : vector<64x128xi1>, vector<64x128xf32>
    %96 = vector.extract_strided_slice %95 {offsets = [0, 0], sizes = [64, 64], strides = [1, 1]} : vector<64x128xf32> to vector<64x64xf32>
    %97 = vector.extract_strided_slice %95 {offsets = [0, 64], sizes = [64, 64], strides = [1, 1]} : vector<64x128xf32> to vector<64x64xf32>
    %cst_19 = arith.constant dense<0.000000e+00> : vector<64x64xf32>
    %98 = tpu.matmul %96, %97, %cst_19 {dimension_numbers = #tpu.dot_dimension_numbers<[1], [1], [0], [0], [0, 0, 1, 0], [], []>} : vector<64x64xf32>, vector<64x64xf32>, vector<64x64xf32> -> vector<64x64xf32>
    %99 = tpu.iota {dimensions = array<i32: 0>} : vector<64x64xi32>
    %100 = tpu.iota {dimensions = array<i32: 1>} : vector<64x64xi32>
    %c7_i32 = arith.constant 7 : i32
    %101 = vector.broadcast %c7_i32 : i32 to vector<64x64xi32>
    %102 = arith.andi %99, %101 : vector<64x64xi32>
    %c7_i32_20 = arith.constant 7 : i32
    %103 = vector.broadcast %c7_i32_20 : i32 to vector<64x64xi32>
    %104 = arith.andi %100, %103 : vector<64x64xi32>
    %105 = arith.cmpi eq, %102, %104 : vector<64x64xi32>
    %c4_i32 = arith.constant 4 : i32
    %106 = vector.broadcast %c4_i32 : i32 to vector<64x64xi32>
    %107 = arith.cmpi slt, %102, %106 : vector<64x64xi32>
    %108 = arith.andi %105, %107 : vector<64x64xi1>
    %109 = arith.mulf %98, %98 : vector<64x64xf32>
    %cst_21 = arith.constant 0.000000e+00 : f32
    %110 = vector.broadcast %cst_21 : f32 to vector<64x64xf32>
    %111 = arith.select %108, %109, %110 : vector<64x64xi1>, vector<64x64xf32>
    %112 = vector.shape_cast %111 : vector<64x64xf32> to vector<1x64x64xf32>
    %cst_22 = arith.constant dense<0.000000e+00> : vector<1xf32>
    %113 = vector.multi_reduction <add>, %112, %cst_22 [1, 2] : vector<1x64x64xf32> to vector<1xf32>
    %114 = vector.shape_cast %113 : vector<1xf32> to vector<1x1x1xf32>
    %115 = vector.extract %114[0, 0, 0] : f32 from vector<1x1x1xf32>
    %cst_23 = arith.constant 2.000000e+00 : f32
    %116 = arith.divf %115, %cst_23 : f32
    %117 = vector.extract_strided_slice %90 {offsets = [0, 0], sizes = [2, 128], strides = [1, 1]} : vector<8x128xf32> to vector<2x128xf32>
    %118 = vector.extract_strided_slice %90 {offsets = [2, 0], sizes = [2, 128], strides = [1, 1]} : vector<8x128xf32> to vector<2x128xf32>
    %119 = arith.mulf %117, %118 : vector<2x128xf32>
    %120 = arith.subf %117, %118 : vector<2x128xf32>
    %121 = math.absf %120 : vector<2x128xf32>
    %122 = tpu.concatenate %117, %118, %119, %121 in 1 : vector<2x128xf32>, vector<2x128xf32>, vector<2x128xf32>, vector<2x128xf32> -> vector<2x512xf32>
    %c0_24 = arith.constant 0 : index
    %c0_25 = arith.constant 0 : index
    %123 = vector.load %arg4[%c0_24, %c0_25] : memref<512x64xf32, #tpu.memory_space<vmem>>, vector<512x64xf32>
    %cst_26 = arith.constant dense<0.000000e+00> : vector<2x64xf32>
    %124 = tpu.matmul %122, %123, %cst_26 {dimension_numbers = #tpu.dot_dimension_numbers<[1], [0], [0], [1], [0, 0, 1, 1], [], []>} : vector<2x512xf32>, vector<512x64xf32>, vector<2x64xf32> -> vector<2x64xf32>
    %125 = vector.broadcast %5 : vector<1x64xf32> to vector<2x64xf32>
    %126 = arith.addf %124, %125 : vector<2x64xf32>
    %127 = math.tanh %126 : vector<2x64xf32>
    %cst_27 = arith.constant dense<0.000000e+00> : vector<2x64xf32>
    %128 = tpu.matmul %127, %9, %cst_27 {dimension_numbers = #tpu.dot_dimension_numbers<[1], [0], [0], [1], [0, 0, 1, 1], [], []>} : vector<2x64xf32>, vector<64x64xf32>, vector<2x64xf32> -> vector<2x64xf32>
    %129 = vector.broadcast %6 : vector<1x64xf32> to vector<2x64xf32>
    %130 = arith.addf %128, %129 : vector<2x64xf32>
    %131 = math.tanh %130 : vector<2x64xf32>
    %cst_28 = arith.constant dense<0.000000e+00> : vector<2x3xf32>
    %132 = tpu.matmul %131, %10, %cst_28 {dimension_numbers = #tpu.dot_dimension_numbers<[1], [0], [0], [1], [0, 0, 1, 1], [], []>} : vector<2x64xf32>, vector<64x3xf32>, vector<2x3xf32> -> vector<2x3xf32>
    %133 = vector.broadcast %7 : vector<1x3xf32> to vector<2x3xf32>
    %134 = arith.addf %132, %133 : vector<2x3xf32>
    %135 = vector.extract_strided_slice %90 {offsets = [0, 64], sizes = [8, 64], strides = [1, 1]} : vector<8x128xf32> to vector<8x64xf32>
    %cst_29 = arith.constant 0.000000e+00 : f32
    %136 = vector.broadcast %cst_29 : f32 to vector<2x61xf32>
    %137 = tpu.concatenate %134, %136 in 1 : vector<2x3xf32>, vector<2x61xf32> -> vector<2x64xf32>
    %138 = vector.broadcast %116 : f32 to vector<1x1xf32>
    %cst_30 = arith.constant 0.000000e+00 : f32
    %139 = vector.broadcast %cst_30 : f32 to vector<1x63xf32>
    %140 = tpu.concatenate %138, %139 in 1 : vector<1x1xf32>, vector<1x63xf32> -> vector<1x64xf32>
    %cst_31 = arith.constant 0.000000e+00 : f32
    %141 = vector.broadcast %cst_31 : f32 to vector<5x64xf32>
    %142 = tpu.concatenate %137, %140, %141 in 0 : vector<2x64xf32>, vector<1x64xf32>, vector<5x64xf32> -> vector<8x64xf32>
    %143 = tpu.concatenate %135, %142 in 1 : vector<8x64xf32>, vector<8x64xf32> -> vector<8x128xf32>
    %c0_32 = arith.constant 0 : index
    %c0_33 = arith.constant 0 : index
    %144 = vector.load %arg6[%c0_32, %c0_33] : memref<8x128xf32, #tpu.memory_space<vmem>>, vector<8x128xf32>
    tpu.vector_store %arg6[%c0_32, %c0_33], %143 {strides = array<i32>} : memref<8x128xf32, #tpu.memory_space<vmem>>, vector<8x128xf32>,
    return
  }
}

</mosaic_0001>

<bundles_post_ra>
// kernel: generator_forward.1
= control target key start
LH: loop header
LB: loop body
LE: loop exit
PB: predicated region body
PF: predicated region fallthrough
CT: control target
= control target key end

     0   :  { %v2760_v0 = vmov 0   ;;  %v60_v27 = vlaneseq  ;;  %vm118_vm0 = vcmask 523264   ;;  %v2761_v31 = vmov 0.0   ;;  %s2764_s18 = smov 64   ;;  %s3697_s0 = inlined_call_operand.vmem [shape: s32[64,1], index: 0, kind: input, shape index: {}]   ;;  %s3698_s1 = inlined_call_operand.vmem [shape: f32[64,32], index: 1, kind: input, shape index: {}]   ;;  %s3699_s2 = inlined_call_operand.vmem [shape: f32[160,128], index: 2, kind: input, shape index: {}]   ;;  %s3700_s3 = inlined_call_operand.vmem [shape: f32[3,128], index: 3, kind: input, shape index: {}]   ;;  %s3701_s4 = inlined_call_operand.vmem [shape: f32[512,64], index: 4, kind: input, shape index: {}]   ;;  %s3702_s5 = inlined_call_operand.vmem [shape: f32[64,128], index: 5, kind: input, shape index: {}]   ;;  %s3703_s6 = inlined_call_operand.vmem [shape: f32[8,128], index: 6, kind: output, shape index: {}]  }
   0x1   :  { %2697 = vset.pattern.permute.xlu0 %v2760_v0  ;;  %v52_v1 = vld [vmem:[%s3697_s0] sm:$0xff]  ;;  %2698 = vset.pattern.permute.xlu1 %v2760_v0  ;;  %v54_v2 = vld [vmem:[%s3697_s0 + $0x10] sm:$0xff]  ;;  %v53_v3 = vld [vmem:[%s3697_s0 + $0x8] sm:$0xff]  ;;  %v2762_v49 = vmov 0.0|0.0   ;;  %vm2763_vm9 = vmmov 0   ;;  %vm252_vm10 = vcmask 261120  }
   0x2   :  { %63 = vperm.xlu0 %2697, %v52_v1   ;;  %69 = vperm.xlu1 %2698, %v54_v2   ;;  %v55_v4 = vld [vmem:[%s3697_s0 + $0x18] sm:$0xff]  ;;  %v110_v5 = vld [vmem:[%s3698_s1] sm:$0xff]  ;;  %v111_v6 = vld [vmem:[%s3698_s1 + $0x8] sm:$0xff]  ;;  %v2861_v28 = vand.u32 127, %v60_v27 }
   0x3   :  { %v112_v7 = vld [vmem:[%s3698_s1 + $0x10] sm:$0xff]  ;;  %v113_v8 = vld [vmem:[%s3698_s1 + $0x18] sm:$0xff]  ;;  %v2362_v9 = vpack.c.bf16 %v111_v6, %v110_v5  ;;  %v114_v11 = vld [vmem:[%s3698_s1 + $0x20] sm:$0xff] }
   0x4   :  { %v2366_v10 = vpack.c.bf16 %v113_v8, %v112_v7  ;;  %v115_v12 = vld [vmem:[%s3698_s1 + $0x28] sm:$0xff]  ;;  %v56_v13 = vld [vmem:[%s3697_s0 + $0x20] sm:$0xff]  ;;  %v116_v16 = vld [vmem:[%s3698_s1 + $0x30] sm:$0xff] }
   0x5   :  { %v57_v14 = vld [vmem:[%s3697_s0 + $0x28] sm:$0xff]  ;;  %2363 = vmatprep.subr.bf16.mxu0 %v2362_v9  ;;  %v2370_v15 = vpack.c.bf16 %v115_v12, %v114_v11  ;;  %v117_v17 = vld [vmem:[%s3698_s1 + $0x38] sm:$0xff]  ;;  %v58_v18 = vld [vmem:[%s3697_s0 + $0x30] sm:$0xff] }
   0x6   :  { %66 = vperm.xlu0 %2697, %v53_v3   ;;  %72 = vperm.xlu1 %2698, %v55_v4   ;;  %v59_v19 = vld [vmem:[%s3697_s0 + $0x38] sm:$0xff]  ;;  %v2374_v20 = vpack.c.bf16 %v117_v17, %v116_v16  ;;  %v23_v21 = vld [vmem:[%s3699_s2] sm:$0xff]  ;;  %v24_v22 = vld [vmem:[%s3699_s2 + $0x8] sm:$0xff] }
   0x7   :  { %2365 = vmatpush3.bf16.msra.mxu0 %v2362_v9  ;;  %v25_v23 = vld [vmem:[%s3699_s2 + $0x10] sm:$0xff]  ;;  %v2378_v24 = vpack.c.bf16 %v24_v22, %v23_v21  ;;  %v26_v25 = vld [vmem:[%s3699_s2 + $0x18] sm:$0xff]  ;;  %v27_v46 = vld [vmem:[%s3699_s2 + $0x20] sm:$0xff] }
   0x8   :  { %2367 = vmatprep.subr.bf16.mxu0 %v2366_v10  ;;  %v2382_v26 = vpack.c.bf16 %v26_v25, %v25_v23  ;;  %v28_v47 = vld [vmem:[%s3699_s2 + $0x28] sm:$0xff]  ;;  %v29_v50 = vld [vmem:[%s3699_s2 + $0x30] sm:$0xff]  ;;  %v30_v51 = vld [vmem:[%s3699_s2 + $0x38] sm:$0xff]  ;;  %v382_v23 = vand.u32 32, %v2861_v28 }
   0x9   :  { %2379 = vmatprep.subr.bf16.mxu1 %v2378_v24  ;;  %v2893_v48 = vpack.c.bf16 %v28_v47, %v27_v46  ;;  %v2905_v52 = vpack.c.bf16 %v30_v51, %v29_v50  ;;  %v31_v53 = vld [vmem:[%s3699_s2 + $0x40] sm:$0xff]  ;;  %v32_v54 = vld [vmem:[%s3699_s2 + $0x48] sm:$0xff]  ;;  %v33_v56 = vld [vmem:[%s3699_s2 + $0x50] sm:$0xff] }
   0xa   :  { %75 = vperm.xlu0 %2697, %v56_v13   ;;  %78 = vperm.xlu1 %2698, %v57_v14   ;;  %v2915_v55 = vpack.c.bf16 %v32_v54, %v31_v53  ;;  %v34_v57 = vld [vmem:[%s3699_s2 + $0x58] sm:$0xff]  ;;  %v35_v59 = vld [vmem:[%s3699_s2 + $0x60] sm:$0xff]  ;;  %v36_v60 = vld [vmem:[%s3699_s2 + $0x68] sm:$0xff]  ;;  %vm3033_vm11 = vcmp.eq.s32.totalorder %v382_v23, 0 }
   0xb   :  { %2369 = vmatpush3.bf16.msra.mxu0 %v2366_v10  ;;  %2381 = vmatpush3.bf16.msra.mxu1 %v2378_v24  ;;  %v2925_v58 = vpack.c.bf16 %v34_v57, %v33_v56  ;;  %v2935_v61 = vpack.c.bf16 %v36_v60, %v35_v59  ;;  %v37_v62 = vld [vmem:[%s3699_s2 + $0x70] sm:$0xff]  ;;  %v38_v63 = vld [vmem:[%s3699_s2 + $0x78] sm:$0xff]  ;;  %v39_v1 = vld [vmem:[%s3699_s2 + $0x80] sm:$0xff] }
   0xc   :  { %2371 = vmatprep.subr.bf16.mxu0 %v2370_v15  ;;  %2383 = vmatprep.subr.bf16.mxu1 %v2382_v26  ;;  %v2945_v0 = vpack.c.bf16 %v38_v63, %v37_v62  ;;  %v40_v2 = vld [vmem:[%s3699_s2 + $0x88] sm:$0xff]  ;;  %v41_v4 = vld [vmem:[%s3699_s2 + $0x90] sm:$0xff]  ;;  %v42_v5 = vld [vmem:[%s3699_s2 + $0x98] sm:$0xff] }
   0xd   :  { %v2955_v3 = vpack.c.bf16 %v40_v2, %v39_v1  ;;  %v2965_v6 = vpack.c.bf16 %v42_v5, %v41_v4  ;;  %v3023_v17 = vld [vmem:[%s3700_s3] sm:$0x7]  ;;  %v1256_v23 = vld [vmem:[%s3701_s4 + $0x98] sm:$0xff]  ;;  %vm3430_vm12 = vmpackc.low %vm118_vm0, %vm118_vm0 }
   0xe   :  { %81 = vperm.xlu0 %2697, %v58_v18   ;;  %84 = vperm.xlu1 %2698, %v59_v19  }
   0xf   :  { %2373 = vmatpush3.bf16.msra.mxu0 %v2370_v15  ;;  %2385 = vmatpush3.bf16.msra.mxu1 %v2382_v26  ;;  %v3017_v15 = vshrl.u32 %v60_v27, 7 }
  0x10   :  { %2375 = vmatprep.subr.bf16.mxu0 %v2374_v20  ;;  %2386 = vmatprep.subr.bf16.mxu1 %v2762_v49 }
  0x11   :  { %v250_v16 = vsub.s32 0, %v3017_v15 }
  0x13   :  { %2377 = vmatpush3.bf16.msra.mxu0 %v2374_v20  ;;  %v251_v18 = vrot.slane %v3023_v17, %v250_v16 }
  0x14   :  { %2410 = vmatprep.subr.bf16.mxu0 %v2762_v49 }
  0x81   :  { %v64_v29 = vpop.permute.xlu0 %63  ;;  %v70_v30 = vpop.permute.xlu1 %69 }
  0x82   :  { %vm86_vm1 = vcmp.eq.s32.totalorder %v64_v29, %v2861_v28  ;;  %vm88_vm2 = vcmp.eq.s32.totalorder %v70_v30, %v2861_v28 }
  0x83   :  { %v1658_v32 = vsel %vm86_vm1, 1.0, %v2761_v31  ;;  %v1660_v35 = vsel %vm88_vm2, 1.0, %v2761_v31 }
  0x84   :  { %1984 = vmatprep.mubr.msk.f32.mxu0 %vm118_vm0, %v1658_v32 }
  0x85   :  { %v67_v33 = vpop.permute.xlu0 %66  ;;  %v73_v34 = vpop.permute.xlu1 %72 }
  0x86   :  { %vm87_vm3 = vcmp.eq.s32.totalorder %v67_v33, %v2861_v28  ;;  %vm89_vm4 = vcmp.eq.s32.totalorder %v73_v34, %v2861_v28 }
  0x87   :  { %v1659_v36 = vsel %vm87_vm3, 1.0, %v2761_v31  ;;  %v1661_v37 = vsel %vm89_vm4, 1.0, %v2761_v31 }
  0x88   :  { %1985 = vmatmul.mubr.msk.f32.vlgmr.msra.gmra.mrb[0].mxu0 %vm118_vm0, %v1659_v36 }
  0x89   :  { %v76_v38 = vpop.permute.xlu0 %75  ;;  %1987 = vmatprep.mubr.msk.f32.mxu0 %vm118_vm0, %v1660_v35  ;;  %v79_v39 = vpop.permute.xlu1 %78  ;;  %2412 = vmatpush3.bf16.msra.mxu0 %v2893_v48 }
  0x8a   :  { %vm90_vm5 = vcmp.eq.s32.totalorder %v76_v38, %v2861_v28  ;;  %vm91_vm6 = vcmp.eq.s32.totalorder %v79_v39, %v2861_v28  ;;  %2413 = vmatprep.subr.bf16.mxu0 %v2762_v49 }
  0x8b   :  { %v1662_v40 = vsel %vm90_vm5, 1.0, %v2761_v31  ;;  %v1663_v41 = vsel %vm91_vm6, 1.0, %v2761_v31 }
  0x8c   :  { %1988 = vmatmul.mubr.msk.f32.gmra.mrb[2].mxu0 %vm118_vm0, %v1661_v37 }
  0x8d   :  { %1990 = vmatprep.mubr.msk.f32.mxu0 %vm118_vm0, %v1662_v40  ;;  %v82_v42 = vpop.permute.xlu0 %81  ;;  %v85_v43 = vpop.permute.xlu1 %84  ;;  %2415 = vmatpush3.bf16.msra.mxu0 %v2905_v52 }
  0x8e   :  { %vm92_vm7 = vcmp.eq.s32.totalorder %v82_v42, %v2861_v28  ;;  %vm93_vm8 = vcmp.eq.s32.totalorder %v85_v43, %v2861_v28  ;;  %2416 = vmatprep.subr.bf16.mxu0 %v2762_v49 }
  0x8f   :  { %v1664_v44 = vsel %vm92_vm7, 1.0, %v2761_v31  ;;  %v1665_v45 = vsel %vm93_vm8, 1.0, %v2761_v31 }
  0x90   :  { %1991 = vmatmul.mubr.msk.f32.gmra.mrb[4].mxu0 %vm118_vm0, %v1663_v41 }
  0x91   :  { %1993 = vmatprep.mubr.msk.f32.mxu0 %vm118_vm0, %v1664_v44  ;;  %2418 = vmatpush3.bf16.msra.mxu0 %v2915_v55 }
  0x92   :  { %2419 = vmatprep.subr.bf16.mxu0 %v2762_v49 }
  0x94   :  { %1994 = vmatmul.mubr.msk.f32.gmra.mrb[6].mxu0 %vm118_vm0, %v1665_v45 }
  0x95   :  { %2421 = vmatpush3.bf16.msra.mxu0 %v2925_v58  ;;  %2083 = vmatprep.mubr.msk.f32.mxu0 %vm2763_vm9, %v2761_v31 }
  0x96   :  { %2422 = vmatprep.subr.bf16.mxu0 %v2762_v49 }
  0x99   :  { %2424 = vmatpush3.bf16.msra.mxu0 %v2935_v61 }
  0x9a   :  { %2425 = vmatprep.subr.bf16.mxu0 %v2762_v49 }
  0x9d   :  { %2427 = vmatpush3.bf16.msra.mxu0 %v2945_v0 }
  0x9e   :  { %2428 = vmatprep.subr.bf16.mxu0 %v2762_v49 }
  0xa1   :  { %2430 = vmatpush3.bf16.msra.mxu0 %v2955_v3 }
  0xa2   :  { %2431 = vmatprep.subr.bf16.mxu0 %v2762_v49 }
  0xa5   :  { %2433 = vmatpush3.bf16.msra.mxu0 %v2965_v6 }
  0xa6   :  { %2458 = vmatprep.subr.bf16.mxu0 %v2762_v49 }
 0x15b   :  { %v1986_v7 = vpop.f32.mrb[0].mxu0 }
 0x15c   :  { %v209_v8 = vpop.f32.mrb[1].mxu0 }
 0x15d   :  { %2004 = vmatprep.mubr.msk.f32.mxu1 %vm252_vm10, %v209_v8 }
 0x15e   :  { %2005 = vmatmul.mubr.msk.f32.vlgmr.msra.gmra.mrb[0].mxu1 %vm252_vm10, %v1986_v7 }
 0x15f   :  { %2388 = vmatpush3.bf16.msra.mxu1 %v2893_v48  ;;  %v1989_v9 = vpop.f32.mrb[2].mxu0 }
 0x160   :  { %v219_v10 = vpop.f32.mrb[3].mxu0  ;;  %2389 = vmatprep.subr.bf16.mxu1 %v2762_v49 }
 0x161   :  { %2007 = vmatprep.mubr.msk.f32.mxu1 %vm252_vm10, %v219_v10 }
 0x162   :  { %2008 = vmatmul.mubr.msk.f32.gmra.mrb[2].mxu1 %vm252_vm10, %v1989_v9 }
 0x163   :  { %2391 = vmatpush3.bf16.msra.mxu1 %v2905_v52  ;;  %v1992_v11 = vpop.f32.mrb[4].mxu0 }
 0x164   :  { %v229_v12 = vpop.f32.mrb[5].mxu0  ;;  %2392 = vmatprep.subr.bf16.mxu1 %v2762_v49 }
 0x165   :  { %2010 = vmatprep.mubr.msk.f32.mxu1 %vm252_vm10, %v229_v12  ;;  %v1254_v12 = vld [vmem:[%s3701_s4 + $0x88] sm:$0xff] }
 0x166   :  { %2011 = vmatmul.mubr.msk.f32.gmra.mrb[4].mxu1 %vm252_vm10, %v1992_v11 }
 0x167   :  { %2394 = vmatpush3.bf16.msra.mxu1 %v2915_v55  ;;  %v1995_v13 = vpop.f32.mrb[6].mxu0 }
 0x168   :  { %v239_v14 = vpop.f32.mrb[7].mxu0  ;;  %2395 = vmatprep.subr.bf16.mxu1 %v2762_v49 }
 0x169   :  { %2013 = vmatprep.mubr.msk.f32.mxu1 %vm252_vm10, %v239_v14 }
 0x16a   :  { %2014 = vmatmul.mubr.msk.f32.gmra.mrb[6].mxu1 %vm252_vm10, %v1995_v13 }
 0x16b   :  { %2397 = vmatpush3.bf16.msra.mxu1 %v2925_v58  ;;  %2048 = vmatprep.mubr.msk.f32.mxu1 %vm2763_vm9, %v2761_v31 }
 0x16c   :  { %2398 = vmatprep.subr.bf16.mxu1 %v2762_v49 }
 0x16f   :  { %2400 = vmatpush3.bf16.msra.mxu1 %v2935_v61 }
 0x170   :  { %2401 = vmatprep.subr.bf16.mxu1 %v2762_v49 }
 0x173   :  { %2403 = vmatpush3.bf16.msra.mxu1 %v2945_v0 }
 0x174   :  { %2404 = vmatprep.subr.bf16.mxu1 %v2762_v49 }
 0x177   :  { %2406 = vmatpush3.bf16.msra.mxu1 %v2955_v3 }
 0x178   :  { %2407 = vmatprep.subr.bf16.mxu1 %v2762_v49 }
 0x17b   :  { %2409 = vmatpush3.bf16.msra.mxu1 %v2965_v6 }
 0x17c   :  { %2434 = vmatprep.subr.bf16.mxu1 %v2762_v49 }
 0x17e   :  { %2049 = vmatmul.mubr.f32.vlgmr.msra.gmra.mrb[8].mxu1 %v2761_v31 }
 0x17f   :  { %2436 = vmatpush3.bf16.msra.mxu1 %v2893_v48  ;;  %2118 = vmatprep.mubr.msk.f32.mxu1 %vm2763_vm9, %v2761_v31 }
 0x180   :  { %2437 = vmatprep.subr.bf16.mxu1 %v2762_v49 }
 0x183   :  { %2439 = vmatpush3.bf16.msra.mxu1 %v2905_v52 }
 0x184   :  { %2440 = vmatprep.subr.bf16.mxu1 %v2762_v49 }
 0x187   :  { %2442 = vmatpush3.bf16.msra.mxu1 %v2915_v55 }
 0x188   :  { %2443 = vmatprep.subr.bf16.mxu1 %v2762_v49 }
 0x18b   :  { %2445 = vmatpush3.bf16.msra.mxu1 %v2925_v58 }
 0x18c   :  { %2446 = vmatprep.subr.bf16.mxu1 %v2762_v49 }
 0x18f   :  { %2448 = vmatpush3.bf16.msra.mxu1 %v2935_v61 }
 0x190   :  { %2449 = vmatprep.subr.bf16.mxu1 %v2762_v49 }
 0x193   :  { %2451 = vmatpush3.bf16.msra.mxu1 %v2945_v0 }
 0x194   :  { %2452 = vmatprep.subr.bf16.mxu1 %v2762_v49 }
 0x197   :  { %2454 = vmatpush3.bf16.msra.mxu1 %v2955_v3 }
 0x198   :  { %2455 = vmatprep.subr.bf16.mxu1 %v2762_v49 }
 0x19b   :  { %2457 = vmatpush3.bf16.msra.mxu1 %v2965_v6 }
 0x19c   :  { %2482 = vmatprep.subr.bf16.mxu1 %v2762_v49 }
 0x231   :  { %v2006_v19 = vpop.f32.mrb[0].mxu1 }
 0x232   :  { %v3026_v20 = vadd.f32 %v2006_v19, %v251_v18  ;;  %v343_v21 = vpop.f32.mrb[1].mxu1  ;;  %v1237_v19 = vld [vmem:[%s3701_s4] sm:$0xff] }
 0x233   :  { %v3057_v39 = vadd.f32 %v343_v21, %v251_v18  ;;  %v1238_v21 = vld [vmem:[%s3701_s4 + $0x8] sm:$0xff] }
 0x235   :  { %v2009_v22 = vpop.f32.mrb[2].mxu1 }
 0x236   :  { %v3029_v24 = vadd.f32 %v2009_v22, %v251_v18  ;;  %v353_v25 = vpop.f32.mrb[3].mxu1  ;;  %v1255_v22 = vld [vmem:[%s3701_s4 + $0x90] sm:$0xff] }
 0x237   :  { %v3031_v26 = vadd.f32 %v353_v25, %v251_v18  ;;  %v1239_v25 = vld [vmem:[%s3701_s4 + $0x10] sm:$0xff] }
 0x239   :  { %v2012_v27 = vpop.f32.mrb[4].mxu1 }
 0x23a   :  { %v3037_v30 = vadd.f32 %v2012_v27, %v251_v18  ;;  %v363_v32 = vpop.f32.mrb[5].mxu1 }
 0x23b   :  { %v3039_v33 = vadd.f32 %v363_v32, %v251_v18  ;;  %v1258_v32 = vld [vmem:[%s3701_s4 + $0xa8] sm:$0xff] }
 0x23c   :  { %v388_v34 = vsel %vm3033_vm11, %v3031_v26, %v3037_v30  ;;  %v391_v35 = vsel %vm3033_vm11, %v3037_v30, %v3031_v26  ;;  %v1240_v26 = vld [vmem:[%s3701_s4 + $0x18] sm:$0xff]  ;;  %v1257_v30 = vld [vmem:[%s3701_s4 + $0xa0] sm:$0xff] }
 0x23d   :  { %v2015_v36 = vpop.f32.mrb[6].mxu1  ;;  %v389_v37 = vsel %vm3033_vm11, %v3029_v24, %v3039_v33  ;;  %v390_v38 = vsel %vm3033_vm11, %v3039_v33, %v3029_v24  ;;  %v2606_v24 = vpack.c.bf16 %v1256_v23, %v1255_v22  ;;  %v2608_v33 = vpack.c.bf16 %v1240_v26, %v1239_v25 }
 0x23e   :  { %v3059_v40 = vadd.f32 %v2015_v36, %v251_v18  ;;  %v373_v41 = vpop.f32.mrb[7].mxu1  ;;  %v1242_v36 = vld [vmem:[%s3701_s4 + $0x28] sm:$0xff] }
 0x23f   :  { %v3061_v42 = vadd.f32 %v373_v41, %v251_v18  ;;  %v1260_v41 = vld [vmem:[%s3701_s4 + $0xb8] sm:$0xff] }
 0x240   :  { %v386_v43 = vsel %vm3033_vm11, %v3057_v39, %v3059_v40  ;;  %v393_v44 = vsel %vm3033_vm11, %v3059_v40, %v3057_v39 }
 0x241   :  { %v387_v45 = vsel %vm3033_vm11, %v3026_v20, %v3061_v42  ;;  %v392_v46 = vsel %vm3033_vm11, %v3061_v42, %v3026_v20  ;;  %v2604_v20 = vpack.c.bf16 %v1238_v21, %v1237_v19  ;;  %v51_v19 = vld [vmem:[%s3702_s5 + $0x38] sm:$0xff] }
 0x251   :  { %v460_v47 = vpop.f32.mrb[8].mxu1 }
 0x252   :  { %v464_v50 = vadd.f32 %v460_v47, %v386_v43  ;;  %v2050_v51 = vpop.f32.mrb[9].mxu1  ;;  %v1243_v43 = vld [vmem:[%s3701_s4 + $0x30] sm:$0xff]  ;;  %v1261_v47 = vld [vmem:[%s3701_s4 + $0xc0] sm:$0xff] }
 0x253   :  { %v1245_v51 = vld [vmem:[%s3701_s4 + $0x40] sm:$0xff] }
 0x254   :  { %2739 = vtanh.f32 %v464_v50  ;;  %v1262_v50 = vld [vmem:[%s3701_s4 + $0xc8] sm:$0xff] }
 0x25e   :  { %v3079_v53 = vpop.eup %2739 }
 0x25f   :  { %2084 = vmatmul.mubr.f32.vlgmr.msra.gmra.mrb[8].mxu0 %v3079_v53 }
 0x260   :  { %2460 = vmatpush3.bf16.msra.mxu0 %v2893_v48  ;;  %2153 = vmatprep.mubr.msk.f32.mxu0 %vm2763_vm9, %v2761_v31 }
 0x261   :  { %2461 = vmatprep.subr.bf16.mxu0 %v2762_v49 }
 0x264   :  { %2463 = vmatpush3.bf16.msra.mxu0 %v2905_v52 }
 0x265   :  { %2464 = vmatprep.subr.bf16.mxu0 %v2762_v49 }
 0x268   :  { %2466 = vmatpush3.bf16.msra.mxu0 %v2915_v55 }
 0x269   :  { %2467 = vmatprep.subr.bf16.mxu0 %v2762_v49 }
 0x26c   :  { %2469 = vmatpush3.bf16.msra.mxu0 %v2925_v58 }
 0x26d   :  { %2470 = vmatprep.subr.bf16.mxu0 %v2762_v49 }
 0x270   :  { %2472 = vmatpush3.bf16.msra.mxu0 %v2935_v61 }
 0x271   :  { %2473 = vmatprep.subr.bf16.mxu0 %v2762_v49 }
 0x274   :  { %2475 = vmatpush3.bf16.msra.mxu0 %v2945_v0 }
 0x275   :  { %2476 = vmatprep.subr.bf16.mxu0 %v2762_v49 }
 0x278   :  { %2478 = vmatpush3.bf16.msra.mxu0 %v2955_v3 }
 0x279   :  { %2479 = vmatprep.subr.bf16.mxu0 %v2762_v49 }
 0x27c   :  { %2481 = vmatpush3.bf16.msra.mxu0 %v2965_v6 }
 0x27d   :  { %2506 = vmatprep.subr.bf16.mxu0 %v2762_v49 }
 0x332   :  { %v532_v54 = vpop.f32.mrb[8].mxu0 }
 0x333   :  { %v536_v56 = vadd.f32 %v532_v54, %v387_v45  ;;  %v2085_v57 = vpop.f32.mrb[9].mxu0  ;;  %v1244_v45 = vld [vmem:[%s3701_s4 + $0x38] sm:$0xff]  ;;  %v2618_v54 = vpack.c.bf16 %v1262_v50, %v1261_v47 }
 0x334   :  { %v1263_v57 = vld [vmem:[%s3701_s4 + $0xd0] sm:$0xff] }
 0x335   :  { %2741 = vtanh.f32 %v536_v56  ;;  %v1246_v56 = vld [vmem:[%s3701_s4 + $0x48] sm:$0xff] }
 0x33f   :  { %v3100_v59 = vpop.eup %2741 }
 0x340   :  { %2119 = vmatmul.mubr.f32.vlgmr.msra.gmra.mrb[10].mxu1 %v3100_v59 }
 0x341   :  { %2484 = vmatpush3.bf16.msra.mxu1 %v2893_v48  ;;  %2188 = vmatprep.mubr.msk.f32.mxu1 %vm2763_vm9, %v2761_v31 }
 0x342   :  { %2485 = vmatprep.subr.bf16.mxu1 %v2762_v49 }
 0x345   :  { %2487 = vmatpush3.bf16.msra.mxu1 %v2905_v52 }
 0x346   :  { %2488 = vmatprep.subr.bf16.mxu1 %v2762_v49 }
 0x349   :  { %2490 = vmatpush3.bf16.msra.mxu1 %v2915_v55 }
 0x34a   :  { %2491 = vmatprep.subr.bf16.mxu1 %v2762_v49 }
 0x34d   :  { %2493 = vmatpush3.bf16.msra.mxu1 %v2925_v58 }
 0x34e   :  { %2494 = vmatprep.subr.bf16.mxu1 %v2762_v49 }
 0x351   :  { %2496 = vmatpush3.bf16.msra.mxu1 %v2935_v61 }
 0x352   :  { %2497 = vmatprep.subr.bf16.mxu1 %v2762_v49 }
 0x355   :  { %2499 = vmatpush3.bf16.msra.mxu1 %v2945_v0 }
 0x356   :  { %2500 = vmatprep.subr.bf16.mxu1 %v2762_v49 }
 0x359   :  { %2502 = vmatpush3.bf16.msra.mxu1 %v2955_v3 }
 0x35a   :  { %2503 = vmatprep.subr.bf16.mxu1 %v2762_v49 }
 0x35d   :  { %2505 = vmatpush3.bf16.msra.mxu1 %v2965_v6 }
 0x35e   :  { %2530 = vmatprep.subr.bf16.mxu1 %v2762_v49 }
 0x413   :  { %v604_v60 = vpop.f32.mrb[10].mxu1 }
 0x414   :  { %v608_v62 = vadd.f32 %v604_v60, %v388_v34  ;;  %v2120_v63 = vpop.f32.mrb[11].mxu1  ;;  %v2610_v34 = vpack.c.bf16 %v1258_v32, %v1257_v30  ;;  %v1264_v60 = vld [vmem:[%s3701_s4 + $0xd8] sm:$0xff]  ;;  %v970_v30 = vmax.f32 %v3079_v53, %v3100_v59 }
 0x415   :  { %v2622_v63 = vpack.c.bf16 %v1264_v60, %v1263_v57  ;;  %v49_v57 = vld [vmem:[%s3702_s5 + $0x28] sm:$0xff] }
 0x416   :  { %2743 = vtanh.f32 %v608_v62  ;;  %v2620_v62 = vpack.c.bf16 %v1246_v56, %v1245_v51  ;;  %v1303_v51 = vsub.s32 1, %v3017_v15  ;;  %v48_v56 = vld [vmem:[%s3702_s5 + $0x20] sm:$0xff] }
 0x417   :  { %v2729_v60 = vpack.i.bf16 %v49_v57, %v48_v56 }
 0x420   :  { %v3121_v1 = vpop.eup %2743 }
 0x421   :  { %2154 = vmatmul.mubr.f32.vlgmr.msra.gmra.mrb[10].mxu0 %v3121_v1 }
 0x422   :  { %2508 = vmatpush3.bf16.msra.mxu0 %v2893_v48  ;;  %2223 = vmatprep.mubr.msk.f32.mxu0 %vm2763_vm9, %v2761_v31 }
 0x423   :  { %2509 = vmatprep.subr.bf16.mxu0 %v2762_v49 }
 0x426   :  { %2511 = vmatpush3.bf16.msra.mxu0 %v2905_v52 }
 0x427   :  { %2512 = vmatprep.subr.bf16.mxu0 %v2762_v49 }
 0x42a   :  { %2514 = vmatpush3.bf16.msra.mxu0 %v2915_v55 }
 0x42b   :  { %2515 = vmatprep.subr.bf16.mxu0 %v2762_v49 }
 0x42e   :  { %2517 = vmatpush3.bf16.msra.mxu0 %v2925_v58 }
 0x42f   :  { %2518 = vmatprep.subr.bf16.mxu0 %v2762_v49 }
 0x432   :  { %2520 = vmatpush3.bf16.msra.mxu0 %v2935_v61 }
 0x433   :  { %2521 = vmatprep.subr.bf16.mxu0 %v2762_v49 }
 0x436   :  { %2523 = vmatpush3.bf16.msra.mxu0 %v2945_v0 }
 0x437   :  { %2524 = vmatprep.subr.bf16.mxu0 %v2762_v49 }
 0x43a   :  { %2526 = vmatpush3.bf16.msra.mxu0 %v2955_v3 }
 0x43b   :  { %2527 = vmatprep.subr.bf16.mxu0 %v2762_v49 }
 0x43e   :  { %2529 = vmatpush3.bf16.msra.mxu0 %v2965_v6 }
 0x43f   :  { %2554 = vmatprep.subr.bf16.mxu0 %v2762_v49 }
 0x4f4   :  { %v676_v2 = vpop.f32.mrb[10].mxu0 }
 0x4f5   :  { %v680_v4 = vadd.f32 %v676_v2, %v389_v37  ;;  %v2155_v5 = vpop.f32.mrb[11].mxu0  ;;  %v1247_v2 = vld [vmem:[%s3701_s4 + $0x50] sm:$0xff] }
 0x4f7   :  { %2745 = vtanh.f32 %v680_v4  ;;  %v1248_v4 = vld [vmem:[%s3701_s4 + $0x58] sm:$0xff] }
 0x4f8   :  { %v2624_v5 = vpack.c.bf16 %v1248_v4, %v1247_v2 }
 0x501   :  { %v3147_v7 = vpop.eup %2745 }
 0x502   :  { %2189 = vmatmul.mubr.f32.vlgmr.msra.gmra.mrb[12].mxu1 %v3147_v7 }
 0x503   :  { %2532 = vmatpush3.bf16.msra.mxu1 %v2893_v48  ;;  %2258 = vmatprep.mubr.msk.f32.mxu1 %vm2763_vm9, %v2761_v31 }
 0x504   :  { %2533 = vmatprep.subr.bf16.mxu1 %v2762_v49 }
 0x507   :  { %2535 = vmatpush3.bf16.msra.mxu1 %v2905_v52 }
 0x508   :  { %2536 = vmatprep.subr.bf16.mxu1 %v2762_v49 }
 0x50b   :  { %2538 = vmatpush3.bf16.msra.mxu1 %v2915_v55 }
 0x50c   :  { %2539 = vmatprep.subr.bf16.mxu1 %v2762_v49 }
 0x50f   :  { %2541 = vmatpush3.bf16.msra.mxu1 %v2925_v58 }
 0x510   :  { %2542 = vmatprep.subr.bf16.mxu1 %v2762_v49 }
 0x513   :  { %2544 = vmatpush3.bf16.msra.mxu1 %v2935_v61 }
 0x514   :  { %2545 = vmatprep.subr.bf16.mxu1 %v2762_v49 }
 0x517   :  { %2547 = vmatpush3.bf16.msra.mxu1 %v2945_v0 }
 0x518   :  { %2548 = vmatprep.subr.bf16.mxu1 %v2762_v49 }
 0x51b   :  { %2550 = vmatpush3.bf16.msra.mxu1 %v2955_v3 }
 0x51c   :  { %2551 = vmatprep.subr.bf16.mxu1 %v2762_v49 }
 0x51f   :  { %2553 = vmatpush3.bf16.msra.mxu1 %v2965_v6 }
 0x5d5   :  { %v748_v8 = vpop.f32.mrb[12].mxu1 }
 0x5d6   :  { %v752_v9 = vadd.f32 %v748_v8, %v390_v38  ;;  %v2190_v10 = vpop.f32.mrb[13].mxu1  ;;  %v1259_v38 = vld [vmem:[%s3701_s4 + $0xb0] sm:$0xff]  ;;  %v1265_v8 = vld [vmem:[%s3701_s4 + $0xe0] sm:$0xff] }
 0x5d7   :  { %v2614_v42 = vpack.c.bf16 %v1260_v41, %v1259_v38  ;;  %v44_v38 = vld [vmem:[%s3702_s5] sm:$0xff] }
 0x5d8   :  { %2747 = vtanh.f32 %v752_v9  ;;  %v1266_v9 = vld [vmem:[%s3701_s4 + $0xe8] sm:$0xff] }
 0x5d9   :  { %v2626_v10 = vpack.c.bf16 %v1266_v9, %v1265_v8  ;;  %v1284_v9 = vld [vmem:[%s3701_s4 + $0x178] sm:$0xff] }
 0x5e2   :  { %v3172_v11 = vpop.eup %2747 }
 0x5e3   :  { %2224 = vmatmul.mubr.f32.vlgmr.msra.gmra.mrb[12].mxu0 %v3172_v11 }
 0x5e4   :  { %2556 = vmatpush3.bf16.msra.mxu0 %v2893_v48  ;;  %2293 = vmatprep.mubr.msk.f32.mxu0 %vm2763_vm9, %v2761_v31 }
 0x5e5   :  { %2557 = vmatprep.subr.bf16.mxu0 %v2762_v49 }
 0x5e8   :  { %2559 = vmatpush3.bf16.msra.mxu0 %v2905_v52 }
 0x5e9   :  { %2560 = vmatprep.subr.bf16.mxu0 %v2762_v49 }
 0x5ec   :  { %2562 = vmatpush3.bf16.msra.mxu0 %v2915_v55 }
 0x5ed   :  { %2563 = vmatprep.subr.bf16.mxu0 %v2762_v49 }
 0x5f0   :  { %2565 = vmatpush3.bf16.msra.mxu0 %v2925_v58 }
 0x5f1   :  { %2566 = vmatprep.subr.bf16.mxu0 %v2762_v49 }
 0x5f4   :  { %2568 = vmatpush3.bf16.msra.mxu0 %v2935_v61 }
 0x5f5   :  { %2569 = vmatprep.subr.bf16.mxu0 %v2762_v49 }
 0x5f8   :  { %2571 = vmatpush3.bf16.msra.mxu0 %v2945_v0  ;;  %v3210_v0 = vsel %vm3033_vm11, %v3147_v7, %v3172_v11 }
 0x5f9   :  { %2572 = vmatprep.subr.bf16.mxu0 %v2762_v49 }
 0x5fc   :  { %2574 = vmatpush3.bf16.msra.mxu0 %v2955_v3 }
 0x5fd   :  { %2575 = vmatprep.subr.bf16.mxu0 %v2762_v49 }
 0x600   :  { %2577 = vmatpush3.bf16.msra.mxu0 %v2965_v6  ;;  %v1253_v6 = vld [vmem:[%s3701_s4 + $0x80] sm:$0xff] }
 0x601   :  { %v2602_v13 = vpack.c.bf16 %v1254_v12, %v1253_v6  ;;  %v1268_v6 = vld [vmem:[%s3701_s4 + $0xf8] sm:$0xff] }
 0x603   :  { %2603 = vmatprep.subr.bf16.mxu0 %v2602_v13  ;;  %v1251_v13 = vld [vmem:[%s3701_s4 + $0x70] sm:$0xff] }
 0x6b6   :  { %v820_v48 = vpop.f32.mrb[12].mxu0 }
 0x6b7   :  { %v824_v52 = vadd.f32 %v820_v48, %v391_v35  ;;  %v2225_v55 = vpop.f32.mrb[13].mxu0  ;;  %v1241_v35 = vld [vmem:[%s3701_s4 + $0x20] sm:$0xff] }
 0x6b8   :  { %v2612_v37 = vpack.c.bf16 %v1242_v36, %v1241_v35  ;;  %v1249_v48 = vld [vmem:[%s3701_s4 + $0x60] sm:$0xff] }
 0x6b9   :  { %2749 = vtanh.f32 %v824_v52  ;;  %v1250_v52 = vld [vmem:[%s3701_s4 + $0x68] sm:$0xff] }
 0x6ba   :  { %v2628_v55 = vpack.c.bf16 %v1250_v52, %v1249_v48 }
 0x6c3   :  { %v3197_v58 = vpop.eup %2749 }
 0x6c4   :  { %2259 = vmatmul.mubr.f32.vlgmr.msra.gmra.mrb[14].mxu1 %v3197_v58  ;;  %v3204_v61 = vsel %vm3033_vm11, %v3121_v1, %v3197_v58  ;;  %v972_v32 = vmax.f32 %v3172_v11, %v3197_v58 }
 0x6c5   :  { %v2704_v3 = vpack.i.bf16 %v3210_v0, %v3204_v61 }
 0x6c7   :  { %2705 = vrot.lane.b32.xlu1 %v2704_v3, %s2764_s18  ;;  %v1267_v3 = vld [vmem:[%s3701_s4 + $0xf0] sm:$0xff] }
 0x6c8   :  { %v2630_v12 = vpack.c.bf16 %v1268_v6, %v1267_v3 }
 0x797   :  { %v892_v14 = vpop.f32.mrb[14].mxu1 }
 0x798   :  { %v896_v16 = vadd.f32 %v892_v14, %v392_v46  ;;  %v2260_v18 = vpop.f32.mrb[15].mxu1  ;;  %v2616_v46 = vpack.c.bf16 %v1244_v45, %v1243_v43  ;;  %v1252_v14 = vld [vmem:[%s3701_s4 + $0x78] sm:$0xff] }
 0x799   :  { %v50_v18 = vld [vmem:[%s3702_s5 + $0x30] sm:$0xff]  ;;  %v47_v43 = vld [vmem:[%s3702_s5 + $0x18] sm:$0xff] }
 0x79a   :  { %2751 = vtanh.f32 %v896_v16  ;;  %v2632_v16 = vpack.c.bf16 %v1252_v14, %v1251_v13  ;;  %v2676_v21 = vpack.c.bf16 %v51_v19, %v50_v18  ;;  %v2734_v50 = vpack.i.bf16 %v51_v19, %v50_v18  ;;  %v1285_v18 = vld [vmem:[%s3701_s4 + $0x180] sm:$0xff]  ;;  %v1286_v19 = vld [vmem:[%s3701_s4 + $0x188] sm:$0xff] }
 0x7a4   :  { %v3244_v27 = vpop.eup %2751 }
 0x7a5   :  { %2294 = vmatmul.mubr.f32.vlgmr.msra.gmra.mrb[14].mxu0 %v3244_v27  ;;  %v3337_v26 = vsel %vm3033_vm11, %v3244_v27, %v3100_v59 }
 0x7a6   :  { %2605 = vmatpush3.bf16.msra.mxu0 %v2604_v20 }
 0x7a7   :  { %2607 = vmatprep.subr.bf16.mxu0 %v2606_v24  ;;  %v971_v24 = vmax.f32 %v3121_v1, %v3147_v7 }
 0x7a9   :  { %v974_v36 = vmax.f32 %v970_v30, %v971_v24  ;;  %v1288_v24 = vld [vmem:[%s3701_s4 + $0x198] sm:$0xff] }
 0x7aa   :  { %2609 = vmatpush3.bf16.msra.mxu0 %v2608_v33 }
 0x7ab   :  { %2611 = vmatprep.subr.bf16.mxu0 %v2610_v34 }
 0x7ae   :  { %2613 = vmatpush3.bf16.msra.mxu0 %v2612_v37 }
 0x7af   :  { %2615 = vmatprep.subr.bf16.mxu0 %v2614_v42 }
 0x7b2   :  { %2617 = vmatpush3.bf16.msra.mxu0 %v2616_v46 }
 0x7b3   :  { %2619 = vmatprep.subr.bf16.mxu0 %v2618_v54  ;;  %v3415_v54 = vrot.slane %v3023_v17, %v1303_v51  ;;  %v2706_v17 = vpop.permute.xlu1 %2705 }
 0x7b4   :  { %v2708_v2 = vunpack.i.h.bf16 %v2706_v17  ;;  %v2707_v4 = vunpack.i.l.bf16 %v2706_v17  ;;  %v1282_v17 = vld [vmem:[%s3701_s4 + $0x168] sm:$0xff] }
 0x7b6   :  { %2621 = vmatpush3.bf16.msra.mxu0 %v2620_v62  ;;  %v2673_v62 = vpack.c.bf16 %v49_v57, %v48_v56  ;;  %v2584_v48 = vpack.c.bf16 %v2708_v2, %v2707_v4  ;;  %v1300_v2 = vld [vmem:[%s3701_s4 + $0x1f8] sm:$0xff] }
 0x7b7   :  { %2623 = vmatprep.subr.bf16.mxu0 %v2622_v63 }
 0x7ba   :  { %2625 = vmatpush3.bf16.msra.mxu0 %v2624_v5 }
 0x7bb   :  { %2627 = vmatprep.subr.bf16.mxu0 %v2626_v10 }
 0x7be   :  { %2629 = vmatpush3.bf16.msra.mxu0 %v2628_v55 }
 0x7bf   :  { %2631 = vmatprep.subr.bf16.mxu0 %v2630_v12 }
 0x7c2   :  { %2633 = vmatpush3.bf16.msra.mxu0 %v2632_v16 }
 0x7c3   :  { %2666 = vmatprep.subr.bf16.mxu0 %v2762_v49 }
 0x878   :  { %v964_v22 = vpop.f32.mrb[14].mxu0 }
 0x879   :  { %v968_v23 = vadd.f32 %v964_v22, %v393_v44  ;;  %v2295_v20 = vpop.f32.mrb[15].mxu0  ;;  %v3355_v44 = vsel %vm3033_vm11, %v3100_v59, %v3244_v27  ;;  %v3374_v59 = vsel %vm3033_vm11, %v3172_v11, %v3147_v7  ;;  %v46_v11 = vld [vmem:[%s3702_s5 + $0x10] sm:$0xff]  ;;  %v1269_v22 = vld [vmem:[%s3701_s4 + $0x100] sm:$0xff] }
 0x87a   :  { %v2670_v46 = vpack.c.bf16 %v47_v43, %v46_v11  ;;  %v2724_v47 = vpack.i.bf16 %v47_v43, %v46_v11  ;;  %v1287_v20 = vld [vmem:[%s3701_s4 + $0x190] sm:$0xff]  ;;  %v1293_v11 = vld [vmem:[%s3701_s4 + $0x1c0] sm:$0xff] }
 0x87b   :  { %2753 = vtanh.f32 %v968_v23  ;;  %v1270_v23 = vld [vmem:[%s3701_s4 + $0x108] sm:$0xff]  ;;  %v2638_v30 = vpack.c.bf16 %v1288_v24, %v1287_v20 }
 0x885   :  { %v2754_v25 = vpop.eup %2753 }
 0x886   :  { %v977_v39 = vsel %vm3033_vm11, %v3079_v53, %v2754_v25  ;;  %v3349_v40 = vsel %vm3033_vm11, %v2754_v25, %v3079_v53  ;;  %v973_v33 = vmax.f32 %v3244_v27, %v2754_v25  ;;  %v3366_v53 = vsel %vm3033_vm11, %v3197_v58, %v3121_v1  ;;  %v45_v1 = vld [vmem:[%s3702_s5 + $0x8] sm:$0xff] }
 0x887   :  { %2312 = vmatprep.mubr.msk.f32.mxu1 %vm118_vm0, %v977_v39  ;;  %v2714_v34 = vpack.i.bf16 %v3349_v40, %v3337_v26  ;;  %v2699_v35 = vpack.i.bf16 %v3355_v44, %v977_v39  ;;  %v2709_v58 = vpack.i.bf16 %v3366_v53, %v3374_v59  ;;  %v2667_v42 = vpack.c.bf16 %v45_v1, %v44_v38  ;;  %v1272_v39 = vld [vmem:[%s3701_s4 + $0x118] sm:$0xff] }
 0x888   :  { %v975_v37 = vmax.f32 %v972_v32, %v973_v33  ;;  %v2719_v29 = vpack.i.bf16 %v45_v1, %v44_v38  ;;  %v2636_v25 = vpack.c.bf16 %v1270_v23, %v1269_v22  ;;  %v1271_v32 = vld [vmem:[%s3701_s4 + $0x110] sm:$0xff]  ;;  %v1289_v33 = vld [vmem:[%s3701_s4 + $0x1a0] sm:$0xff]  ;;  %v1274_v38 = vld [vmem:[%s3701_s4 + $0x128] sm:$0xff]  ;;  %v1151_v22 = vadd.s32 32, %v3017_v15 }
 0x889   :  { %2715 = vrot.lane.b32.xlu1 %v2714_v34, %s2764_s18  ;;  %2700 = vrot.lane.b32.xlu0 %v2699_v35, %s2764_s18  ;;  %v1290_v34 = vld [vmem:[%s3701_s4 + $0x1a8] sm:$0xff]  ;;  %v2640_v35 = vpack.c.bf16 %v1272_v39, %v1271_v32  ;;  %v1291_v1 = vld [vmem:[%s3701_s4 + $0x1b0] sm:$0xff] }
 0x88a   :  { %v3376_v27 = vmax.f32 %v974_v36, %v975_v37  ;;  %v2642_v36 = vpack.c.bf16 %v1290_v34, %v1289_v33  ;;  %v1273_v37 = vld [vmem:[%s3701_s4 + $0x120] sm:$0xff]  ;;  %v1159_v34 = vand.u32 7, %v1151_v22 }
 0x88c   :  { %v3387_v41 = vrot.slane %v3376_v27, 2 }
 0x88d   :  { %2710 = vrot.lane.b32.xlu0 %v2709_v58, %s2764_s18  ;;  %1447 = vrot.lane.b32.xlu1 %v3415_v54, %s2764_s18 }
 0x88e   :  { %v3392_v7 = vmul.f32 %v3387_v41, %v3376_v27  ;;  %1369 = vmatprep.mubr.f32.mxu0 %v3387_v41  ;;  %v1235_v45 = vsub.f32 %v3376_v27, %v3387_v41  ;;  %v1280_v41 = vld [vmem:[%s3701_s4 + $0x158] sm:$0xff] }
 0x88f   :  { %1370 = vmatmul.mubr.f32.vlgmr.msra.gmra.mrb[16].mxu0 %v3376_v27 }
 0x890   :  { %2668 = vmatpush3.bf16.msra.mxu0 %v2667_v42  ;;  %2340 = vmatprep.mubr.msk.f32.mxu0 %vm2763_vm9, %v2761_v31  ;;  %v1275_v42 = vld [vmem:[%s3701_s4 + $0x130] sm:$0xff] }
 0x891   :  { %2720 = vrot.lane.b32.xlu0 %v2719_v29, %s2764_s18  ;;  %2669 = vmatprep.subr.bf16.mxu0 %v2762_v49  ;;  %v1276_v29 = vld [vmem:[%s3701_s4 + $0x138] sm:$0xff] }
 0x892   :  { %2730 = vrot.lane.b32.xlu1 %v2729_v60, %s2764_s18 }
 0x894   :  { %2671 = vmatpush3.bf16.msra.mxu0 %v2670_v46  ;;  %v1277_v46 = vld [vmem:[%s3701_s4 + $0x140] sm:$0xff] }
 0x895   :  { %2725 = vrot.lane.b32.xlu0 %v2724_v47, %s2764_s18  ;;  %2672 = vmatprep.subr.bf16.mxu0 %v2762_v49  ;;  %v1278_v47 = vld [vmem:[%s3701_s4 + $0x148] sm:$0xff] }
 0x896   :  { %v2652_v51 = vpack.c.bf16 %v1278_v47, %v1277_v46 }
 0x898   :  { %2674 = vmatpush3.bf16.msra.mxu0 %v2673_v62  ;;  %v1281_v62 = vld [vmem:[%s3701_s4 + $0x160] sm:$0xff] }
 0x899   :  { %2735 = vrot.lane.b32.xlu0 %v2734_v50, %s2764_s18  ;;  %2675 = vmatprep.subr.bf16.mxu0 %v2762_v49  ;;  %v1236_v50 = vand.u32 2147483647, %v1235_v45  ;;  %v1297_v45 = vld [vmem:[%s3701_s4 + $0x1e0] sm:$0xff]  ;;  %v2660_v4 = vpack.c.bf16 %v1282_v17, %v1281_v62 }
 0x89c   :  { %2677 = vmatpush3.bf16.msra.mxu0 %v2676_v21  ;;  %v2634_v21 = vpack.c.bf16 %v1286_v19, %v1285_v18  ;;  %v1152_v19 = vadd.s32 40, %v3017_v15 }
 0x89d   :  { %1645 = vrot.lane.b32.xlu0 %v3376_v27, %s2764_s18  ;;  %2678 = vmatprep.subr.bf16.mxu0 %v2762_v49  ;;  %v1279_v27 = vld [vmem:[%s3701_s4 + $0x150] sm:$0xff] }
 0x89e   :  { %v2656_v57 = vpack.c.bf16 %v1280_v41, %v1279_v27 }
 0x8fb   :  { %v2701_v63 = vpop.permute.xlu0 %2700  ;;  %v2716_v12 = vpop.permute.xlu1 %2715 }
 0x8fc   :  { %v2703_v5 = vunpack.i.h.bf16 %v2701_v63  ;;  %v2702_v8 = vunpack.i.l.bf16 %v2701_v63  ;;  %v2718_v13 = vunpack.i.h.bf16 %v2716_v12  ;;  %v2717_v14 = vunpack.i.l.bf16 %v2716_v12  ;;  %v1299_v63 = vld [vmem:[%s3701_s4 + $0x1f0] sm:$0xff] }
 0x8fe   :  { %v2578_v10 = vpack.c.bf16 %v2703_v5, %v2702_v8  ;;  %v2596_v16 = vpack.c.bf16 %v2718_v13, %v2717_v14  ;;  %v2662_v5 = vpack.c.bf16 %v1300_v2, %v1299_v63  ;;  %v1283_v8 = vld [vmem:[%s3701_s4 + $0x170] sm:$0xff]  ;;  %v1163_v13 = vand.u32 7, %v2861_v28 }
 0x8ff   :  { %v2711_v52 = vpop.permute.xlu0 %2710  ;;  %v1155_v14 = vand.u32 7, %v3017_v15 }
 0x900   :  { %2580 = vmatprep.subr.msk.bf16.mxu1 %vm3430_vm12, %v2578_v10  ;;  %v2713_v55 = vunpack.i.h.bf16 %v2711_v52  ;;  %v2712_v3 = vunpack.i.l.bf16 %v2711_v52 }
 0x901   :  { %2583 = vmatpush3.bf16.xpose.msk.msra.mxu1 %vm3430_vm12, %v2578_v10  ;;  %v2664_v10 = vpack.c.bf16 %v1284_v9, %v1283_v8  ;;  %vm3581_vm15 = vcmp.eq.s32.totalorder %v1155_v14, %v1163_v13  ;;  %vm3585_vm1 = vcmp.lt.s32.totalorder %v1155_v14, 4 }
 0x902   :  { %2586 = vmatprep.subr.msk.bf16.mxu1 %vm3430_vm12, %v2584_v48  ;;  %v2590_v6 = vpack.c.bf16 %v2713_v55, %v2712_v3  ;;  %v1148_v3 = vadd.s32 8, %v3017_v15  ;;  %vm1180_vm4 = vmand %vm3581_vm15, %vm3585_vm1 }
 0x904   :  { %v1156_v12 = vand.u32 7, %v1148_v3 }
 0x906   :  { %vm3572_vm13 = vcmp.eq.s32.totalorder %v1156_v12, %v1163_v13  ;;  %vm3576_vm14 = vcmp.lt.s32.totalorder %v1156_v12, 4 }
 0x907   :  { %vm1181_vm2 = vmand %vm3572_vm13, %vm3576_vm14  ;;  %vm3633_vm13 = vcmp.eq.s32.totalorder %v1159_v34, %v1163_v13  ;;  %vm3637_vm14 = vcmp.lt.s32.totalorder %v1159_v34, 4  ;;  %v1448_v34 = vpop.permute.xlu1 %1447 }
 0x908   :  { %vm1184_vm1 = vmand %vm3633_vm13, %vm3637_vm14 }
 0x909   :  { %2589 = vmatpush3.bf16.xpose.msk.msra.mxu1 %vm3430_vm12, %v2584_v48 }
 0x90a   :  { %2592 = vmatprep.subr.msk.bf16.mxu1 %vm3430_vm12, %v2590_v6 }
 0x911   :  { %2595 = vmatpush3.bf16.xpose.msk.msra.mxu1 %vm3430_vm12, %v2590_v6  ;;  %v1150_v6 = vadd.s32 24, %v3017_v15 }
 0x912   :  { %2598 = vmatprep.subr.msk.bf16.mxu1 %vm3430_vm12, %v2596_v16 }
 0x913   :  { %v1158_v18 = vand.u32 7, %v1150_v6 }
 0x915   :  { %vm3593_vm3 = vcmp.eq.s32.totalorder %v1158_v18, %v1163_v13  ;;  %vm3601_vm5 = vcmp.lt.s32.totalorder %v1158_v18, 4 }
 0x916   :  { %vm1183_vm8 = vmand %vm3593_vm3, %vm3601_vm5 }
 0x919   :  { %2601 = vmatpush3.bf16.xpose.msk.msra.mxu1 %vm3430_vm12, %v2596_v16  ;;  %v1149_v16 = vadd.s32 16, %v3017_v15 }
 0x91a   :  { %2635 = vmatprep.subr.bf16.mxu1 %v2634_v21 }
 0x91b   :  { %v1157_v20 = vand.u32 7, %v1149_v16 }
 0x91d   :  { %vm3606_vm6 = vcmp.eq.s32.totalorder %v1157_v20, %v1163_v13  ;;  %vm3610_vm7 = vcmp.lt.s32.totalorder %v1157_v20, 4 }
 0x91e   :  { %vm1182_vm12 = vmand %vm3606_vm6, %vm3610_vm7 }
 0x920   :  { %2313 = vmatmul.mubr.msk.f32.vlgmr.msra.gmra.mrb[16].mxu1 %vm118_vm0, %v3355_v44  ;;  %v2644_v44 = vpack.c.bf16 %v1274_v38, %v1273_v37 }
 0x921   :  { %2315 = vmatprep.mubr.msk.f32.mxu1 %vm118_vm0, %v3204_v61  ;;  %2637 = vmatpush3.bf16.msra.mxu1 %v2636_v25  ;;  %v1292_v61 = vld [vmem:[%s3701_s4 + $0x1b8] sm:$0xff] }
 0x922   :  { %2639 = vmatprep.subr.bf16.mxu1 %v2638_v30  ;;  %v2646_v58 = vpack.c.bf16 %v1292_v61, %v1291_v1  ;;  %v1160_v30 = vand.u32 7, %v1152_v19  ;;  %v1153_v1 = vadd.s32 48, %v3017_v15 }
 0x924   :  { %2316 = vmatmul.mubr.msk.f32.gmra.mrb[18].mxu1 %vm118_vm0, %v3210_v0  ;;  %v1294_v0 = vld [vmem:[%s3701_s4 + $0x1c8] sm:$0xff]  ;;  %vm3620_vm10 = vcmp.eq.s32.totalorder %v1160_v30, %v1163_v13  ;;  %vm3624_vm11 = vcmp.lt.s32.totalorder %v1160_v30, 4 }
 0x925   :  { %2318 = vmatprep.mubr.msk.f32.mxu1 %vm118_vm0, %v3374_v59  ;;  %2641 = vmatpush3.bf16.msra.mxu1 %v2640_v35  ;;  %v2648_v59 = vpack.c.bf16 %v1276_v29, %v1275_v42  ;;  %v2650_v43 = vpack.c.bf16 %v1294_v0, %v1293_v11  ;;  %v1154_v35 = vadd.s32 56, %v3017_v15  ;;  %vm1185_vm15 = vmand %vm3620_vm10, %vm3624_vm11  ;;  %vm1641_vm10 = vcmask 1041408  }
 0x926   :  { %2643 = vmatprep.subr.bf16.mxu1 %v2642_v36  ;;  %vm1643_vm11 = vcmask 1042432  }
 0x927   :  { %v1162_v47 = vand.u32 7, %v1154_v35 }
 0x928   :  { %2319 = vmatmul.mubr.msk.f32.gmra.mrb[20].mxu1 %vm118_vm0, %v3366_v53  ;;  %v1296_v53 = vld [vmem:[%s3701_s4 + $0x1d8] sm:$0xff] }
 0x929   :  { %2321 = vmatprep.mubr.msk.f32.mxu1 %vm118_vm0, %v3337_v26  ;;  %2645 = vmatpush3.bf16.msra.mxu1 %v2644_v44  ;;  %v1295_v26 = vld [vmem:[%s3701_s4 + $0x1d0] sm:$0xff]  ;;  %vm3654_vm3 = vcmp.lt.s32.totalorder %v1162_v47, 4 }
 0x92a   :  { %2647 = vmatprep.subr.bf16.mxu1 %v2646_v58  ;;  %v2654_v56 = vpack.c.bf16 %v1296_v53, %v1295_v26 }
 0x92c   :  { %2322 = vmatmul.mubr.msk.f32.gmra.mrb[22].mxu1 %vm118_vm0, %v3349_v40  ;;  %v1298_v40 = vld [vmem:[%s3701_s4 + $0x1e8] sm:$0xff] }
 0x92d   :  { %2649 = vmatpush3.bf16.msra.mxu1 %v2648_v59  ;;  %1439 = vmatprep.mubr.f32.mxu1 %v1236_v50  ;;  %v2658_v60 = vpack.c.bf16 %v1298_v40, %v1297_v45 }
 0x92e   :  { %2651 = vmatprep.subr.bf16.mxu1 %v2650_v43 }
 0x931   :  { %2653 = vmatpush3.bf16.msra.mxu1 %v2652_v51  ;;  %v1161_v51 = vand.u32 7, %v1153_v1 }
 0x932   :  { %2655 = vmatprep.subr.bf16.mxu1 %v2654_v56 }
 0x933   :  { %vm3662_vm5 = vcmp.lt.s32.totalorder %v1161_v51, 4 }
 0x935   :  { %2657 = vmatpush3.bf16.msra.mxu1 %v2656_v57 }
 0x936   :  { %2659 = vmatprep.subr.bf16.mxu1 %v2658_v60 }
 0x939   :  { %2661 = vmatpush3.bf16.msra.mxu1 %v2660_v4 }
 0x93a   :  { %2663 = vmatprep.subr.bf16.mxu1 %v2662_v5 }
 0x93d   :  { %2665 = vmatpush3.bf16.msra.mxu1 %v2664_v10 }
 0x940   :  { %1440 = vmatmul.mubr.f32.vlgmr.msra.gmra.mrb[24].mxu1 %v3392_v7 }
 0x962   :  { %v1912_v48 = vpop.f32.mrb[16].mxu0 }
 0x963   :  { %v1913_v52 = vpop.f32.mrb[17].mxu0 }
 0x964   :  { %v3564_v55 = vadd.f32 %v1913_v52, %v1912_v48 }
 0x9f3   :  { %v2314_v24 = vpop.f32.mrb[16].mxu1 }
 0x9f4   :  { %v1189_v32 = vmul.f32 %v2314_v24, %v2314_v24  ;;  %v1107_v39 = vpop.f32.mrb[17].mxu1  ;;  %v1372_v24 = vadd.f32 %v3564_v55, %v3415_v54 }
 0x9f5   :  { %v1188_v36 = vmul.f32 %v1107_v39, %v1107_v39 }
 0x9f6   :  { %v1197_v61 = vsel %vm1181_vm2, %v1189_v32, 0.0  ;;  %vm3650_vm2 = vcmp.eq.s32.totalorder %v1162_v47, %v1163_v13  ;;  %v2721_v32 = vpop.permute.xlu0 %2720 }
 0x9f7   :  { %v1205_v44 = vsel %vm118_vm0, %v1197_v61, 0.0  ;;  %v1196_v58 = vsel %vm1180_vm4, %v1188_v36, 0.0  ;;  %v2317_v42 = vpop.f32.mrb[18].mxu1  ;;  %vm3658_vm4 = vcmp.eq.s32.totalorder %v1161_v51, %v1163_v13  ;;  %vm1187_vm6 = vmand %vm3650_vm2, %vm3654_vm3  ;;  %v2723_v39 = vunpack.i.h.bf16 %v2721_v32  ;;  %v2731_v61 = vpop.permute.xlu1 %2730 }
 0x9f8   :  { %v1204_v0 = vsel %vm118_vm0, %v1196_v58, 0.0  ;;  %v1191_v59 = vmul.f32 %v2317_v42, %v2317_v42  ;;  %v1117_v43 = vpop.f32.mrb[19].mxu1  ;;  %vm1186_vm7 = vmand %vm3658_vm4, %vm3662_vm5  ;;  %v2722_v33 = vunpack.i.l.bf16 %v2721_v32  ;;  %v2733_v58 = vunpack.i.h.bf16 %v2731_v61 }
 0x9f9   :  { %v1206_v50 = vadd.f32 %v1205_v44, %v1204_v0  ;;  %v1190_v26 = vmul.f32 %v1117_v43, %v1117_v43  ;;  %v2732_v42 = vunpack.i.l.bf16 %v2731_v61 }
 0x9fa   :  { %v1199_v56 = vsel %vm1183_vm8, %v1191_v59, 0.0  ;;  %v2726_v35 = vpop.permute.xlu0 %2725  ;;  %v2679_v36 = vpack.c.bf16 %v2723_v39, %v2722_v33  ;;  %vm1633_vm8 = vcmask 23552  }
 0x9fb   :  { %v1198_v27 = vsel %vm1182_vm12, %v1190_v26, 0.0  ;;  %v2320_v41 = vpop.f32.mrb[20].mxu1  ;;  %v1209_v5 = vsel %vm118_vm0, %v1199_v56, 0.0  ;;  %v2728_v37 = vunpack.i.h.bf16 %v2726_v35  ;;  %v2727_v38 = vunpack.i.l.bf16 %v2726_v35 }
 0x9fc   :  { %v1207_v45 = vsel %vm118_vm0, %v1198_v27, 0.0  ;;  %v1193_v40 = vmul.f32 %v2320_v41, %v2320_v41  ;;  %v1127_v57 = vpop.f32.mrb[21].mxu1  ;;  %v2685_v11 = vpack.c.bf16 %v2733_v58, %v2732_v42 }
 0x9fd   :  { %v1208_v17 = vadd.f32 %v1207_v45, %v1206_v50  ;;  %v1192_v63 = vmul.f32 %v1127_v57, %v1127_v57  ;;  %v2682_v44 = vpack.c.bf16 %v2728_v37, %v2727_v38  ;;  %v2759_v45 = vld [vmem:[%s3700_s3] sm:$0x7] }
 0x9fe   :  { %v1201_v8 = vsel %vm1185_vm15, %v1193_v40, 0.0  ;;  %v2736_v54 = vpop.permute.xlu0 %2735 }
 0x9ff   :  { %v1200_v9 = vsel %vm1184_vm1, %v1192_v63, 0.0  ;;  %v1210_v10 = vadd.f32 %v1209_v5, %v1208_v17  ;;  %v2323_v48 = vpop.f32.mrb[22].mxu1  ;;  %v1213_v14 = vsel %vm118_vm0, %v1201_v8, 0.0  ;;  %v2738_v55 = vunpack.i.h.bf16 %v2736_v54 }
 0xa00   :  { %v1211_v52 = vsel %vm118_vm0, %v1200_v9, 0.0  ;;  %v1195_v3 = vmul.f32 %v2323_v48, %v2323_v48  ;;  %v1137_v6 = vpop.f32.mrb[23].mxu1  ;;  %v2737_v29 = vunpack.i.l.bf16 %v2736_v54 }
 0xa01   :  { %v1212_v12 = vadd.f32 %v1211_v52, %v1210_v10  ;;  %v1194_v13 = vmul.f32 %v1137_v6, %v1137_v6 }
 0xa02   :  { %v1203_v16 = vsel %vm1187_vm6, %v1195_v3, 0.0  ;;  %v2688_v0 = vpack.c.bf16 %v2738_v55, %v2737_v29 }
 0xa03   :  { %v1202_v18 = vsel %vm1186_vm7, %v1194_v13, 0.0  ;;  %v1214_v19 = vadd.f32 %v1213_v14, %v1212_v12  ;;  %v1217_v22 = vsel %vm118_vm0, %v1203_v16, 0.0 }
 0xa04   :  { %v1215_v7 = vsel %vm118_vm0, %v1202_v18, 0.0 }
 0xa05   :  { %v1216_v21 = vadd.f32 %v1215_v7, %v1214_v19 }
 0xa07   :  { %v1218_v23 = vadd.f32 %v1217_v22, %v1216_v21 }
 0xa09   :  { %1219 = vadd.xlane.f32.xlu1 %v1218_v23 }
 0xa13   :  { %v1947_v28 = vpop.f32.mrb[24].mxu1 }
 0xa14   :  { %v1948_v20 = vpop.f32.mrb[25].mxu1 }
 0xa15   :  { %v1949_v25 = vadd.f32 %v1948_v20, %v1947_v28 }
 0xa17   :  { %v1442_v30 = vadd.f32 %v1949_v25, %v1372_v24 }
 0xa19   :  { %2755 = vtanh.f32 %v1442_v30 }
 0xa23   :  { %v2756_v1 = vpop.eup %2755 }
 0xa24   :  { %2341 = vmatmul.mubr.msk.f32.vlgmr.msra.gmra.mrb[18].mxu0 %vm118_vm0, %v2756_v1 }
 0xa25   :  { %2680 = vmatpush3.bf16.msra.mxu0 %v2679_v36  ;;  %2359 = vmatprep.mubr.msk.f32.mxu0 %vm2763_vm9, %v2761_v31  ;;  %vm1636_vm9 = vcmask 7168  }
 0xa26   :  { %2681 = vmatprep.subr.bf16.mxu0 %v2762_v49 }
 0xa29   :  { %2683 = vmatpush3.bf16.msra.mxu0 %v2682_v44 }
 0xa2a   :  { %2684 = vmatprep.subr.bf16.mxu0 %v2762_v49 }
 0xa2d   :  { %2686 = vmatpush3.bf16.msra.mxu0 %v2685_v11 }
 0xa2e   :  { %2687 = vmatprep.subr.bf16.mxu0 %v2762_v49  ;;  %v1526_v49 = vsub.s32 2, %v3017_v15  ;;  %v1646_v15 = vpop.permute.xlu0 %1645 }
 0xa30   :  { %v1527_v40 = vrot.slane %v2759_v45, %v1526_v49 }
 0xa31   :  { %2689 = vmatpush3.bf16.msra.mxu0 %v2688_v0 }
 0xa96   :  { %v1220_v59 = vpop.xlane.xlu1 %1219 }
 0xa97   :  { %v1221_v43 = vrot.slane %v1220_v59, 4 }
 0xa99   :  { %v1222_v46 = vadd.f32 %v1221_v43, %v1220_v59 }
 0xa9b   :  { %v1223_v47 = vrot.slane %v1222_v46, 2 }
 0xa9d   :  { %v1224_v50 = vadd.f32 %v1223_v47, %v1222_v46 }
 0xa9f   :  { %v1225_v31 = vrot.slane %v1224_v50, 1 }
 0xaa1   :  { %v1226_v26 = vadd.f32 %v1225_v31, %v1224_v50 }
 0xaa3   :  { %2690 = vpush %v1226_v26 }
 0xad4   :  { %s2691_s4 = spop %2690 }
 0xad5   :  { %s1230_s30 = smul.f32 0.5, %s2691_s4 }
 0xad7   :  { %v1635_v41 = vstv %s1230_s30 }
 0xad8   :  { %v1637_v57 = vsel %vm1636_vm9, %v1635_v41, 0.0 }
 0xad9   :  { %v1639_v63 = vrot.slane %v1637_v57, 6 }
 0xaf7   :  { %v1519_v53 = vpop.f32.mrb[18].mxu0 }
 0xaf8   :  { %v1520_v51 = vadd.f32 %v1519_v53, %v1448_v34  ;;  %v2342_v56 = vpop.f32.mrb[19].mxu0 }
 0xafa   :  { %2757 = vtanh.f32 %v1520_v51 }
 0xb04   :  { %v2758_v27 = vpop.eup %2757 }
 0xb05   :  { %2360 = vmatmul.mubr.msk.f32.vlgmr.msra.gmra.mrb[20].mxu0 %vm118_vm0, %v2758_v27 }
 0xbd8   :  { %v1629_v60 = vpop.f32.mrb[20].mxu0 }
 0xbd9   :  { %v1630_v62 = vadd.f32 %v1629_v60, %v1527_v40  ;;  %v2361_v17 = vpop.f32.mrb[21].mxu0 }
 0xbdb   :  { %v1634_v2 = vsel %vm1633_vm8, %v1630_v62, 0.0 }
 0xbdc   :  { %v1642_v4 = vsel %vm1641_vm10, %v1634_v2, %v1639_v63 }
 0xbdd   :  { %v1644_v5 = vsel %vm1643_vm11, %v1642_v4, 0.0 }
 0xbde   :  { %1649 = vrot.lane.b32.xlu0 %v1644_v5, %s2764_s18 }
 0xc50   :  { %v1650_v8 = vpop.permute.xlu0 %1649 }
 0xc51   :  { %v1652_v9 = vsel %vm118_vm0, %v1646_v15, %v1650_v8 }
 0xc52   :  { %1653 = vst [vmem:[%s3703_s6] sm:$0xff] %v1652_v9 }

</bundles_post_ra>
